<compile_context>
chip_gen: v5e
topology: v5e:2x2
jax: 0.10.0
libtpu: 0.0.40
codegen_flags: <defaults>
</compile_context>

<pallas_src>
import jax
import jax.numpy as jnp
from jax import lax
from jax.experimental import pallas as pl
from jax.experimental.pallas import tpu as pltpu


def tied_ae_kernel(x_ref, w_ref, eb_ref, db_ref, inv_ref, xhat_ref, c_ref):
    # ---- encoder: c = ReLU(x @ W + encoder_bias)  (original, un-normalized W) ----
    pre = jnp.dot(x_ref[...], w_ref[...], preferred_element_type=jnp.float32)
    c = jnp.maximum(pre + eb_ref[...], 0.0)                       # f32, (TB, D)

    # ---- decoder: x_hat = (c * inv_norm) @ W.T + decoder_bias ----
    # (c * inv_norm) @ W.T == c @ (W * inv_norm).T == c @ normalize(W, dim=0).T
    # Transposed contraction over D on the single resident W (A, D): no W.T copy, no XLU work.
    c_scaled = (c * inv_ref[...]).astype(w_ref.dtype)             # scale in f32, cast for MXU
    x_hat = lax.dot_general(
        c_scaled, w_ref[...],
        dimension_numbers=(((1,), (1,)), ((), ())),               # contract c dim 1 with W dim 1
        preferred_element_type=jnp.float32,
    ) + db_ref[...]

    xhat_ref[...] = x_hat.astype(xhat_ref.dtype)
    c_ref[...] = c.astype(c_ref.dtype)


def _vmem_capacity_bytes():
    """Physical VMEM of the current chip; conservative 64 MiB fallback (v7x per-TC)."""
    try:
        info = pltpu.get_tpu_info()
        cap = getattr(info, "vmem_capacity_bytes", None)
        if cap:
            return int(cap)
    except Exception:
        pass
    return 64 * 1024 * 1024


def _vmem_footprint_bytes(tile_b, A, D, mm_dtype, out_dtype, weight_buffers):
    """Kernel VMEM footprint. Resident (constant-index) blocks counted `weight_buffers` times."""
    mm = jnp.dtype(mm_dtype).itemsize
    ob = jnp.dtype(out_dtype).itemsize
    return (
        2 * tile_b * A * mm                      # x tile, double-buffered
        + weight_buffers * A * D * mm            # resident W
        + weight_buffers * 4 * (D + A + D)       # enc bias, dec bias, inv_norm (f32)
        + 2 * tile_b * (A + D) * ob              # x_hat + c output tiles, double-buffered
    )


def tied_autoencoder_forward(x, w, encoder_bias, decoder_bias, *,
                             tile_b=None, matmul_dtype=jnp.bfloat16, out_dtype=None):
    """x: (B, A); w (decoder.weight): (A, D); encoder_bias: (D,); decoder_bias: (A,)."""
    B, A = x.shape
    A2, D = w.shape
    assert A == A2
    out_dtype = x.dtype if out_dtype is None else out_dtype

    # Lane-dense output guards: keep (tile_b, A) / (tile_b, D) stores as full-lane vst.
    assert A % 128 == 0, f"activation_size ({A}) must be a multiple of 128"
    assert D % 128 == 0, f"n_dict_components ({D}) must be a multiple of 128"

    vmem_cap = int(0.85 * _vmem_capacity_bytes())     # headroom for compiler scratch

    sub = 16 if jnp.dtype(matmul_dtype).itemsize == 2 else 8   # packed-sublane tile for bf16
    if tile_b is None:
        tile_b = B
        for t in (512, 256, 128):                     # prefer >= 2 grid steps (megacore) & big tiles
            if t < B and B % t == 0 and \
               _vmem_footprint_bytes(t, A, D, matmul_dtype, out_dtype, 2) <= vmem_cap:
                tile_b = t
                break
    tile_b = min(tile_b, B)
    assert B % tile_b == 0, "batch must be divisible by tile_b"
    assert tile_b == B or tile_b % sub == 0, \
        f"tile_b should be a multiple of {sub} for {jnp.dtype(matmul_dtype).name} operands"

    # VMEM limit: worst case (weights double-buffered) + 50% margin, floored, generation-capped.
    worst = _vmem_footprint_bytes(tile_b, A, D, matmul_dtype, out_dtype, 2)
    vmem_limit = int(min(vmem_cap, max(32 * 1024 * 1024, int(1.5 * worst) + (2 << 20))))

    # ---- one-time preprocessing in plain XLA: hoisted out of the grid loop ----
    w32 = w.astype(jnp.float32)
    col_norm = jnp.sqrt(jnp.sum(w32 * w32, axis=0, keepdims=True))        # (1, D)
    inv_norm = 1.0 / jnp.maximum(col_norm, 1e-12)                         # F.normalize eps clamp

    x_mm = x.astype(matmul_dtype)
    w_mm = w.astype(matmul_dtype)                                         # single weight layout
    eb = encoder_bias.reshape(1, D).astype(jnp.float32)
    db = decoder_bias.reshape(1, A).astype(jnp.float32)

    grid = (B // tile_b,)

    def make_call(single_buffer_resident):
        # Grid-invariant blocks are DMA'd once; with Buffered(1) they also use a single buffer.
        res_kw = {"pipeline_mode": pl.Buffered(1)} if single_buffer_resident else {}
        return pl.pallas_call(
            tied_ae_kernel,
            out_shape=(
                jax.ShapeDtypeStruct((B, A), out_dtype),
                jax.ShapeDtypeStruct((B, D), out_dtype),
            ),
            grid_spec=pltpu.PrefetchScalarGridSpec(
                num_scalar_prefetch=0,
                grid=grid,
                in_specs=[
                    pl.BlockSpec((tile_b, A), lambda i: (i, 0)),              # x tile (streams)
                    pl.BlockSpec((A, D), lambda i: (0, 0), **res_kw),         # W (resident)
                    pl.BlockSpec((1, D), lambda i: (0, 0), **res_kw),         # encoder bias (f32)
                    pl.BlockSpec((1, A), lambda i: (0, 0), **res_kw),         # decoder bias (f32)
                    pl.BlockSpec((1, D), lambda i: (0, 0), **res_kw),         # inv column norm (f32)
                ],
                out_specs=(
                    pl.BlockSpec((tile_b, A), lambda i: (i, 0)),              # x_hat
                    pl.BlockSpec((tile_b, D), lambda i: (i, 0)),              # c
                ),
            ),
            compiler_params=pltpu.CompilerParams(
                dimension_semantics=("parallel",),    # batch steps shard across TCs (megacore)
                vmem_limit_bytes=vmem_limit,
            ),
        )

    args = (x_mm, w_mm, eb, db, inv_norm)
    try:
        x_hat, c = make_call(True)(*args)
    except Exception:
        # pipeline_mode=pl.Buffered(1) unsupported on this jax/libtpu: default double buffering.
        x_hat, c = make_call(False)(*args)
    return x_hat, c


def init_params(key, activation_size, n_dict_components, dtype=jnp.float32):
    """Deterministic parameter init mirroring the module's __init__ shapes."""
    k_w, k_b = jax.random.split(key)
    # nn.init.orthogonal_ on decoder.weight of shape (activation_size, n_dict_components).
    g = jax.random.normal(k_w, (n_dict_components, activation_size), dtype=jnp.float32)
    q, _ = jnp.linalg.qr(g)                        # (D, A) orthonormal columns
    w = q.T.astype(dtype)                          # (A, D) orthonormal rows
    bound = 1.0 / jnp.sqrt(float(n_dict_components))
    dec_bias = jax.random.uniform(
        k_b, (activation_size,), minval=-bound, maxval=bound, dtype=jnp.float32
    ).astype(dtype)
    enc_bias = jnp.zeros((n_dict_components,), dtype=dtype)
    return w, enc_bias, dec_bias


def reference_forward(x, w, enc_bias, dec_bias):
    c = jax.nn.relu(x @ w + enc_bias)
    w_n = w / jnp.maximum(jnp.linalg.norm(w, axis=0, keepdims=True), 1e-12)
    x_hat = c @ w_n.T + dec_bias
    return x_hat, c


if __name__ == "__main__":
    batch = 256
    activation_size = 128
    n_dict_components = 256

    key = jax.random.PRNGKey(0)
    k_x, k_p = jax.random.split(key)
    x = jax.random.normal(k_x, (batch, activation_size), dtype=jnp.float32)
    w, enc_bias, dec_bias = init_params(k_p, activation_size, n_dict_components)

    x_hat_exp, c_exp = reference_forward(x, w, enc_bias, dec_bias)

    # --- f32 matmul-operand path (tight-ish check) ---
    x_hat32, c32 = tied_autoencoder_forward(x, w, enc_bias, dec_bias, matmul_dtype=jnp.float32)
    jax.block_until_ready((x_hat32, c32))
    assert jnp.allclose(c32, c_exp, atol=1e-2, rtol=1e-2), "f32 path: c mismatch"
    assert jnp.allclose(x_hat32, x_hat_exp, atol=2e-2, rtol=1e-2), "f32 path: x_hat mismatch"

    # --- default fast path: bf16 matmul operands, f32 accumulation, f32 outputs ---
    x_hat, c = tied_autoencoder_forward(x, w, enc_bias, dec_bias)
    jax.block_until_ready((x_hat, c))
    assert jnp.allclose(c, c_exp, atol=5e-2, rtol=5e-2), "bf16 path: c mismatch"
    assert jnp.allclose(x_hat, x_hat_exp, atol=6e-2, rtol=5e-2), "bf16 path: x_hat mismatch"

    # --- bandwidth-optimized path: bf16 outputs (halves the dominant (B, D) c writeback) ---
    x_hat_bf, c_bf = tied_autoencoder_forward(x, w, enc_bias, dec_bias, out_dtype=jnp.bfloat16)
    jax.block_until_ready((x_hat_bf, c_bf))
    assert jnp.allclose(c_bf.astype(jnp.float32), c_exp, atol=1e-1, rtol=1e-1), \
        "bf16-out path: c mismatch"
    assert jnp.allclose(x_hat_bf.astype(jnp.float32), x_hat_exp, atol=1e-1, rtol=1e-1), \
        "bf16-out path: x_hat mismatch"

    print("KERNEL_OK")
</pallas_src>

<mosaic_0001>
module attributes {stable_mosaic.version = 11 : i64} {
  func.func @tied_ae_kernel(%arg0: i32, %arg1: memref<128x128xf32, #tpu.memory_space<vmem>>, %arg2: memref<128x256xf32, #tpu.memory_space<vmem>>, %arg3: memref<1x256xf32, #tpu.memory_space<vmem>>, %arg4: memref<1x128xf32, #tpu.memory_space<vmem>>, %arg5: memref<1x256xf32, #tpu.memory_space<vmem>>, %arg6: memref<128x128xf32, #tpu.memory_space<vmem>>, %arg7: memref<128x256xf32, #tpu.memory_space<vmem>>) attributes {dimension_semantics = [#tpu.dimension_semantics<parallel>], iteration_bounds = array<i64: 2>, scalar_prefetch = 0 : i64, scratch_operands = 0 : i64, tpu.core_type = #tpu.core_type<tc>, window_params = [{transform_indices = @transform_0, window_bounds = array<i64: 128, 128>}, {pipeline_mode = #tpu.pipeline_mode<synchronous>, transform_indices = @transform_1, window_bounds = array<i64: 128, 256>}, {pipeline_mode = #tpu.pipeline_mode<synchronous>, transform_indices = @transform_2, window_bounds = array<i64: 1, 256>}, {pipeline_mode = #tpu.pipeline_mode<synchronous>, transform_indices = @transform_3, window_bounds = array<i64: 1, 128>}, {pipeline_mode = #tpu.pipeline_mode<synchronous>, transform_indices = @transform_4, window_bounds = array<i64: 1, 256>}, {transform_indices = @transform_5, window_bounds = array<i64: 128, 128>}, {transform_indices = @transform_6, window_bounds = array<i64: 128, 256>}]} {
    %c0 = arith.constant 0 : index
    %c0_0 = arith.constant 0 : index
    %0 = vector.load %arg1[%c0, %c0_0] : memref<128x128xf32, #tpu.memory_space<vmem>>, vector<128x128xf32>
    %c0_1 = arith.constant 0 : index
    %c0_2 = arith.constant 0 : index
    %1 = vector.load %arg2[%c0_1, %c0_2] : memref<128x256xf32, #tpu.memory_space<vmem>>, vector<128x256xf32>
    %cst = arith.constant dense<0.000000e+00> : vector<128x256xf32>
    %2 = tpu.matmul %0, %1, %cst {dimension_numbers = #tpu.dot_dimension_numbers<[1], [0], [0], [1], [0, 0, 1, 1], [], []>} : vector<128x128xf32>, vector<128x256xf32>, vector<128x256xf32> -> vector<128x256xf32>
    %c0_3 = arith.constant 0 : index
    %c0_4 = arith.constant 0 : index
    %3 = vector.load %arg3[%c0_3, %c0_4] : memref<1x256xf32, #tpu.memory_space<vmem>>, vector<1x256xf32>
    %4 = vector.broadcast %3 : vector<1x256xf32> to vector<128x256xf32>
    %5 = arith.addf %2, %4 : vector<128x256xf32>
    %cst_5 = arith.constant 0.000000e+00 : f32
    %6 = vector.broadcast %cst_5 : f32 to vector<128x256xf32>
    %7 = arith.maximumf %5, %6 : vector<128x256xf32>
    %c0_6 = arith.constant 0 : index
    %c0_7 = arith.constant 0 : index
    %8 = vector.load %arg5[%c0_6, %c0_7] : memref<1x256xf32, #tpu.memory_space<vmem>>, vector<1x256xf32>
    %9 = vector.broadcast %8 : vector<1x256xf32> to vector<128x256xf32>
    %10 = arith.mulf %7, %9 : vector<128x256xf32>
    %c0_8 = arith.constant 0 : index
    %c0_9 = arith.constant 0 : index
    %11 = vector.load %arg2[%c0_8, %c0_9] : memref<128x256xf32, #tpu.memory_space<vmem>>, vector<128x256xf32>
    %cst_10 = arith.constant dense<0.000000e+00> : vector<128x128xf32>
    %12 = tpu.matmul %10, %11, %cst_10 {dimension_numbers = #tpu.dot_dimension_numbers<[1], [1], [0], [0], [0, 0, 1, 0], [], []>} : vector<128x256xf32>, vector<128x256xf32>, vector<128x128xf32> -> vector<128x128xf32>
    %c0_11 = arith.constant 0 : index
    %c0_12 = arith.constant 0 : index
    %13 = vector.load %arg4[%c0_11, %c0_12] : memref<1x128xf32, #tpu.memory_space<vmem>>, vector<1x128xf32>
    %14 = vector.broadcast %13 : vector<1x128xf32> to vector<128x128xf32>
    %15 = arith.addf %12, %14 : vector<128x128xf32>
    %c0_13 = arith.constant 0 : index
    %c0_14 = arith.constant 0 : index
    %16 = vector.load %arg6[%c0_13, %c0_14] : memref<128x128xf32, #tpu.memory_space<vmem>>, vector<128x128xf32>
    tpu.vector_store %arg6[%c0_13, %c0_14], %15 {strides = array<i32>} : memref<128x128xf32, #tpu.memory_space<vmem>>, vector<128x128xf32>,
    %c0_15 = arith.constant 0 : index
    %c0_16 = arith.constant 0 : index
    %17 = vector.load %arg7[%c0_15, %c0_16] : memref<128x256xf32, #tpu.memory_space<vmem>>, vector<128x256xf32>
    tpu.vector_store %arg7[%c0_15, %c0_16], %7 {strides = array<i32>} : memref<128x256xf32, #tpu.memory_space<vmem>>, vector<128x256xf32>,
    return
  }
  func.func @transform_0(%arg0: i32) -> (i32, i32) {
    %c0_i32 = arith.constant 0 : i32
    %c0_i32_0 = arith.constant 0 : i32
    return %arg0, %c0_i32 : i32, i32
  }
  func.func @transform_1(%arg0: i32) -> (i32, i32) {
    %c0_i32 = arith.constant 0 : i32
    %c0_i32_0 = arith.constant 0 : i32
    %c0_i32_1 = arith.constant 0 : i32
    return %c0_i32, %c0_i32_0 : i32, i32
  }
  func.func @transform_2(%arg0: i32) -> (i32, i32) {
    %c0_i32 = arith.constant 0 : i32
    %c0_i32_0 = arith.constant 0 : i32
    %c0_i32_1 = arith.constant 0 : i32
    return %c0_i32, %c0_i32_0 : i32, i32
  }
  func.func @transform_3(%arg0: i32) -> (i32, i32) {
    %c0_i32 = arith.constant 0 : i32
    %c0_i32_0 = arith.constant 0 : i32
    %c0_i32_1 = arith.constant 0 : i32
    return %c0_i32, %c0_i32_0 : i32, i32
  }
  func.func @transform_4(%arg0: i32) -> (i32, i32) {
    %c0_i32 = arith.constant 0 : i32
    %c0_i32_0 = arith.constant 0 : i32
    %c0_i32_1 = arith.constant 0 : i32
    return %c0_i32, %c0_i32_0 : i32, i32
  }
  func.func @transform_5(%arg0: i32) -> (i32, i32) {
    %c0_i32 = arith.constant 0 : i32
    %c0_i32_0 = arith.constant 0 : i32
    return %arg0, %c0_i32 : i32, i32
  }
  func.func @transform_6(%arg0: i32) -> (i32, i32) {
    %c0_i32 = arith.constant 0 : i32
    %c0_i32_0 = arith.constant 0 : i32
    return %arg0, %c0_i32 : i32, i32
  }
}

module attributes {stable_mosaic.version = 11 : i64} {
  func.func @tied_ae_kernel(%arg0: i32, %arg1: memref<128x128xf32, #tpu.memory_space<vmem>>, %arg2: memref<128x256xf32, #tpu.memory_space<vmem>>, %arg3: memref<1x256xf32, #tpu.memory_space<vmem>>, %arg4: memref<1x128xf32, #tpu.memory_space<vmem>>, %arg5: memref<1x256xf32, #tpu.memory_space<vmem>>, %arg6: memref<128x128xf32, #tpu.memory_space<vmem>>, %arg7: memref<128x256xf32, #tpu.memory_space<vmem>>) attributes {dimension_semantics = [#tpu.dimension_semantics<parallel>], iteration_bounds = array<i64: 2>, scalar_prefetch = 0 : i64, scratch_operands = 0 : i64, tpu.core_type = #tpu.core_type<tc>, window_params = [{transform_indices = @transform_0, window_bounds = array<i64: 128, 128>}, {pipeline_mode = #tpu.pipeline_mode<synchronous>, transform_indices = @transform_1, window_bounds = array<i64: 128, 256>}, {pipeline_mode = #tpu.pipeline_mode<synchronous>, transform_indices = @transform_2, window_bounds = array<i64: 1, 256>}, {pipeline_mode = #tpu.pipeline_mode<synchronous>, transform_indices = @transform_3, window_bounds = array<i64: 1, 128>}, {pipeline_mode = #tpu.pipeline_mode<synchronous>, transform_indices = @transform_4, window_bounds = array<i64: 1, 256>}, {transform_indices = @transform_5, window_bounds = array<i64: 128, 128>}, {transform_indices = @transform_6, window_bounds = array<i64: 128, 256>}]} {
    %c0 = arith.constant 0 : index
    %c0_0 = arith.constant 0 : index
    %0 = vector.load %arg1[%c0, %c0_0] : memref<128x128xf32, #tpu.memory_space<vmem>>, vector<128x128xf32>
    %c0_1 = arith.constant 0 : index
    %c0_2 = arith.constant 0 : index
    %1 = vector.load %arg2[%c0_1, %c0_2] : memref<128x256xf32, #tpu.memory_space<vmem>>, vector<128x256xf32>
    %cst = arith.constant dense<0.000000e+00> : vector<128x256xf32>
    %2 = tpu.matmul %0, %1, %cst {dimension_numbers = #tpu.dot_dimension_numbers<[1], [0], [0], [1], [0, 0, 1, 1], [], []>} : vector<128x128xf32>, vector<128x256xf32>, vector<128x256xf32> -> vector<128x256xf32>
    %c0_3 = arith.constant 0 : index
    %c0_4 = arith.constant 0 : index
    %3 = vector.load %arg3[%c0_3, %c0_4] : memref<1x256xf32, #tpu.memory_space<vmem>>, vector<1x256xf32>
    %4 = vector.broadcast %3 : vector<1x256xf32> to vector<128x256xf32>
    %5 = arith.addf %2, %4 : vector<128x256xf32>
    %cst_5 = arith.constant 0.000000e+00 : f32
    %6 = vector.broadcast %cst_5 : f32 to vector<128x256xf32>
    %7 = arith.maximumf %5, %6 : vector<128x256xf32>
    %c0_6 = arith.constant 0 : index
    %c0_7 = arith.constant 0 : index
    %8 = vector.load %arg5[%c0_6, %c0_7] : memref<1x256xf32, #tpu.memory_space<vmem>>, vector<1x256xf32>
    %9 = vector.broadcast %8 : vector<1x256xf32> to vector<128x256xf32>
    %10 = arith.mulf %7, %9 : vector<128x256xf32>
    %c0_8 = arith.constant 0 : index
    %c0_9 = arith.constant 0 : index
    %11 = vector.load %arg2[%c0_8, %c0_9] : memref<128x256xf32, #tpu.memory_space<vmem>>, vector<128x256xf32>
    %cst_10 = arith.constant dense<0.000000e+00> : vector<128x128xf32>
    %12 = tpu.matmul %10, %11, %cst_10 {dimension_numbers = #tpu.dot_dimension_numbers<[1], [1], [0], [0], [0, 0, 1, 0], [], []>} : vector<128x256xf32>, vector<128x256xf32>, vector<128x128xf32> -> vector<128x128xf32>
    %c0_11 = arith.constant 0 : index
    %c0_12 = arith.constant 0 : index
    %13 = vector.load %arg4[%c0_11, %c0_12] : memref<1x128xf32, #tpu.memory_space<vmem>>, vector<1x128xf32>
    %14 = vector.broadcast %13 : vector<1x128xf32> to vector<128x128xf32>
    %15 = arith.addf %12, %14 : vector<128x128xf32>
    %c0_13 = arith.constant 0 : index
    %c0_14 = arith.constant 0 : index
    %16 = vector.load %arg6[%c0_13, %c0_14] : memref<128x128xf32, #tpu.memory_space<vmem>>, vector<128x128xf32>
    tpu.vector_store %arg6[%c0_13, %c0_14], %15 {strides = array<i32>} : memref<128x128xf32, #tpu.memory_space<vmem>>, vector<128x128xf32>,
    %c0_15 = arith.constant 0 : index
    %c0_16 = arith.constant 0 : index
    %17 = vector.load %arg7[%c0_15, %c0_16] : memref<128x256xf32, #tpu.memory_space<vmem>>, vector<128x256xf32>
    tpu.vector_store %arg7[%c0_15, %c0_16], %7 {strides = array<i32>} : memref<128x256xf32, #tpu.memory_space<vmem>>, vector<128x256xf32>,
    return
  }
  func.func @transform_0(%arg0: i32) -> (i32, i32) {
    %c0_i32 = arith.constant 0 : i32
    %c0_i32_0 = arith.constant 0 : i32
    return %arg0, %c0_i32 : i32, i32
  }
  func.func @transform_1(%arg0: i32) -> (i32, i32) {
    %c0_i32 = arith.constant 0 : i32
    %c0_i32_0 = arith.constant 0 : i32
    %c0_i32_1 = arith.constant 0 : i32
    return %c0_i32, %c0_i32_0 : i32, i32
  }
  func.func @transform_2(%arg0: i32) -> (i32, i32) {
    %c0_i32 = arith.constant 0 : i32
    %c0_i32_0 = arith.constant 0 : i32
    %c0_i32_1 = arith.constant 0 : i32
    return %c0_i32, %c0_i32_0 : i32, i32
  }
  func.func @transform_3(%arg0: i32) -> (i32, i32) {
    %c0_i32 = arith.constant 0 : i32
    %c0_i32_0 = arith.constant 0 : i32
    %c0_i32_1 = arith.constant 0 : i32
    return %c0_i32, %c0_i32_0 : i32, i32
  }
  func.func @transform_4(%arg0: i32) -> (i32, i32) {
    %c0_i32 = arith.constant 0 : i32
    %c0_i32_0 = arith.constant 0 : i32
    %c0_i32_1 = arith.constant 0 : i32
    return %c0_i32, %c0_i32_0 : i32, i32
  }
  func.func @transform_5(%arg0: i32) -> (i32, i32) {
    %c0_i32 = arith.constant 0 : i32
    %c0_i32_0 = arith.constant 0 : i32
    return %arg0, %c0_i32 : i32, i32
  }
  func.func @transform_6(%arg0: i32) -> (i32, i32) {
    %c0_i32 = arith.constant 0 : i32
    %c0_i32_0 = arith.constant 0 : i32
    return %arg0, %c0_i32 : i32, i32
  }
}

</mosaic_0001>

<bundles_post_ra>
// kernel: tpu_custom_call.1
= control target key start
LH: loop header
LB: loop body
LE: loop exit
PB: predicated region body
PF: predicated region fallthrough
CT: control target
= control target key end

     0   :  { %12 = vsyncpa [#allocation3], 0  ;;  %s1785_s0 = inlined_call_operand.hbm [shape: f32[256,128], index: 0, kind: input, shape index: {}]   ;;  %s1786_s1 = inlined_call_operand.hbm [shape: f32[128,256], index: 1, kind: input, shape index: {}]   ;;  %s1787_s2 = inlined_call_operand.hbm [shape: f32[1,256], index: 2, kind: input, shape index: {}]   ;;  %s1788_s3 = inlined_call_operand.vmem [shape: f32[1,128], index: 3, kind: input, shape index: {}]   ;;  %s1789_s4 = inlined_call_operand.vmem [shape: f32[1,256], index: 4, kind: input, shape index: {}]   ;;  %s1790_s5 = inlined_call_operand.hbm [shape: f32[256,128], index: 5, kind: output, shape index: {0}]   ;;  %s1791_s6 = inlined_call_operand.hbm [shape: f32[256,256], index: 6, kind: output, shape index: {1}]  }
   0x1   :  { %14 = vsyncpa [#allocation3 + $0x1], 0 }
   0x2   :  { %15 = vsyncpa [#allocation6], 0 }
   0x3   :  { %16 = vsyncpa [#allocation4], 0 }
   0x4   :  { %18 = vsyncpa [#allocation4 + $0x1], 0 }
   0x5   :  { %19 = vsyncpa [#allocation10], 0 }
   0x6   :  { %21 = vsyncpa [#allocation10 + $0x1], 0  ;;  %s1296_s21 = smov 0   ;;  %s1298_s22 = smov 0  }
   0x7   :  { %s1300_s23 = smov 0   ;;  %s1302_s24 = smov 0  }
   0x8 LB: > { %s1317_s25 = sadd.s32 4294967295, %s1249_s24   ;;  %s917_s26 = sadd.s32 4294967294, %s1249_s24   ;;  %s1249_s24 = sphi %s1302_s24, %s1801_s24   ;;  %s1245_s23 = sphi %s1300_s23, %s1800_s23   ;;  %s1241_s22 = sphi %s1298_s22, %s1799_s22   ;;  %s1237_s21 = sphi %s1296_s21, %s1798_s21  }
   0x9   : > { %p47_p0 = scmp.ne.s32.totalorder %s1241_s22, %s1237_s21  ;;  %p48_p1 = scmp.eq.s32.totalorder %s1317_s25, 0 }
   0xa   : > { %p155_p2 = scmp.eq.s32.totalorder %s1317_s25, 1  ;;  %p161_p3 = scmp.eq.s32.totalorder %s917_s26, 1 }
   0xb   : > { %p1326_p4 = por %p48_p1, %p47_p0  ;;  %p918_p5 = scmp.ge.s32.totalorder %s1249_s24, 1 }
   0xc   : > { %p1331_p6 = por %p161_p3, %p47_p0  ;;  %p194_p7 = scmp.lt.s32.totalorder %s1249_s24, 3 }
   0xd   : > { %s205_s7 = sshll.u32 %s1786_s1, 4  ;;  %s1251_s9 = smov [#allocation5]   ;;  %s206_s7 = int_to_ptr.hbm [resolvable:$true] %s205_s7 }
   0xe   : > { %p1339_p8 = pnand %p918_p5, %p194_p7  ;;  %s207_s10 = sshll.u32 %s1251_s9, 4  ;;  %s208_s10 = int_to_ptr.vmem [resolvable:$true] %s207_s10 }
   0xf   : > { %s220_s13 = sshll.u32 %s1787_s2, 4  ;;  %s1252_s14 = smov 256   ;;  %s221_s13 = int_to_ptr.hbm [resolvable:$true] %s220_s13 }
  0x10   : > { %p990_p9 = pneg %p1339_p8  ;;  %s1253_s15 = smov 16  }
  0x11   : > { %s1254_s16 = smov [#allocation7]   ;;  %s1352_s18 = sadd.s32 1, %s1249_s24  }
  0x12   : > { %p991_p10 = pnand %p990_p9, %p48_p1  ;;  %s222_s17 = sshll.u32 %s1254_s16, 4  ;;  %s223_s17 = int_to_ptr.vmem [resolvable:$true] %s222_s17 }
  0x13   : > { %s34_s19 = sadd.s32 1, %s1245_s23  ;;  %s31_s20 = ssub.s32 %s1249_s24, %s1352_s18 }
  0x14   : > { %993 = dma.hbm_to_vmem [thread:$0]  (!%p991_p10), %s206_s7, 4096, %s208_s10, [#allocation6], %s1252_s14, %s1252_s14, %s1253_s15  }
  0x15   : > { %996 = dma.hbm_to_vmem [thread:$0]  (!%p991_p10), %s221_s13, 32, %s223_s17, [#allocation6]  }
  0x16   : > { %p41_p12 = scmp.ne.s32.totalorder %s1245_s23, %s1241_s22  ;;  %p32_p13 = scmp.eq.s32.totalorder %s31_s20, 0 }
  0x17   : > { %p42_p0 = scmp.eq.s32.totalorder %s1249_s24, 0  ;;  %p1010_p5 = scmp.lt.s32.totalorder %s1249_s24, 2 }
  0x18   : > { %p1362_p3 = por %p155_p2, %p41_p12  ;;  %s239_s30 = sand.u32 1, %s1245_s23  }
  0x19   : > { %s1368_s29 = scalar_select %p32_p13, %s1245_s23, %s34_s19  }
  0x1a   : > { %p43_p7 = por %p42_p0, %p41_p12  ;;  %s922_s7 = sshll.u32 %s239_s30, 7 }
  0x1b   : > { %s940_s9 = sshll.u32 %s1249_s24, 7  ;;  %s243_s13 = scalar_lea.vmem [#allocation2], %s922_s7 }
  0x1c   : > { %s248_s12 = scalar_lea.hbm %s1785_s0, %s940_s9  ;;  %s251_s14 = sshll.u32 %s243_s13, 4  ;;  %s252_s14 = int_to_ptr.vmem [resolvable:$true] %s251_s14 }
  0x1d   : > { %s249_s15 = sshll.u32 %s248_s12, 4  ;;  %p1375_p2 = pnand %p1010_p5, %p43_p7  ;;  %s250_s15 = int_to_ptr.hbm [resolvable:$true] %s249_s15 }
  0x1e   : > { %s240_s17 = scalar_lea.sflag [#allocation3], %s239_s30  ;;  %s1117_s19 = sshra.s32 %s250_s15, 4  ;;  %s1118_s19 = int_to_ptr.hbm [resolvable:$true] %s1117_s19 }
  0x1f   : > { %s1119_s20 = scalar_lea.hbm %s1118_s19, 128  ;;  %p1121_p10 = pneg %p1375_p2 }
  0x20   : > { %p1120_p9 = scmp.ne.s32.totalorder %s1118_s19, %s1119_s20  ;;  %s1124_s10 = scalar_lea.hbm %s1785_s0, 256 }
  0x21   : > { %p1125_p0 = scmp.lt.s32.totalorder %s1118_s19, %s1785_s0  ;;  %p1126_p5 = scmp.lt.s32.totalorder %s1124_s10, %s1119_s20 }
  0x22   : > { %p1122_p12 = pnand %p1121_p10, %p1120_p9 }
  0x23   : > { %p1127_p7 = por %p1126_p5, %p1125_p0 }
  0x24   : > { %p1123_p13 = pneg %p1122_p12 }
  0x26   : > { %p1128_p11 = pnand %p1127_p7, %p1123_p13 }
  0x28   : > { %1131 = shalt.err (!%p1128_p11)
}
  0x29   : > { %s1255_s30 = smov 128   ;;  %s1256_s13 = smov 8  }
  0x2a   : > { %1000 = dma.hbm_to_vmem [thread:$0]  (!%p1375_p2), %s250_s15, 2048, %s252_s14, %s240_s17, %s1255_s30, %s1255_s30, %s1256_s13  }
  0x2b   : > { %263 = sbr.rel (%p1339_p8) target bundleno = 475 (0x1db), region = 40  ;;  %s1392_s9 = sand.u32 (!%p1339_p8), 1, %s1241_s22  }
  0x2c   : > { %s926_s19 = sshll.u32 (!%p1339_p8), %s1392_s9, 7  ;;  %s266_s20 = scalar_lea.sflag (!%p1339_p8), [#allocation3], %s1392_s9 }
  0x2d   : > { %s1398_s7 = scalar_lea.vmem (!%p1339_p8), [#allocation2], %s926_s19 }
  0x30   : > { %1220 = dma.done.wait (%p1326_p4), %s266_s20, 2048  }
  0x31   : > { %1222 = vsyncadd (%p1326_p4), %s266_s20, 4294965248 }
  0x32   : > { %1224 = dma.done.wait (%p48_p1), [#allocation6], 4128  }
  0x33   : > { %1226 = vsyncadd (%p48_p1), [#allocation6], 4294963168  ;;  %v1408_v0 = vld [vmem:[#allocation5 + $0xf0] sm:$0xff]  ;;  %v1410_v1 = vld [vmem:[#allocation5 + $0xe0] sm:$0xff]  ;;  %s930_s14 = sshll.u32 %s1392_s9, 8  ;;  %s943_s10 = sshll.u32 %s1317_s25, 8 }
  0x34   : > { %v1412_v2 = vld [vmem:[#allocation5 + $0xf8] sm:$0xff]  ;;  %371 = vmatpush.msra.mxu0 %v1408_v0  ;;  %v1416_v3 = vld [vmem:[#allocation5 + $0xe8] sm:$0xff]  ;;  %v1418_v4 = vld [vmem:[#allocation5 + $0xd0] sm:$0xff]  ;;  %944 = vmatpush.xpose.msra.mxu2 %v1408_v0  ;;  %s1599_s15 = scalar_lea.vmem [#allocation9], %s930_s14  ;;  %s788_s30 = scalar_lea.hbm %s1791_s6, %s943_s10 }
  0x35   : > { %436 = vmatpush.msra.mxu1 %v1412_v2  ;;  %v1420_v5 = vld [vmem:[#allocation5 + $0xd8] sm:$0xff]  ;;  %960 = vmatpush.xpose.msra.mxu3 %v1412_v2  ;;  %v1426_v6 = vld [vmem:[#allocation5 + $0xc0] sm:$0xff]  ;;  %v1428_v7 = vld [vmem:[#allocation5 + $0xc8] sm:$0xff]  ;;  %s1706_s13 = scalar_lea.vmem [#allocation8], %s926_s19  ;;  %s789_s20 = sshll.u32 %s1599_s15, 4  ;;  %s790_s20 = int_to_ptr.vmem [resolvable:$true] %s789_s20 }
  0x36   : > { %372 = vmatpush.msra.mxu0 %v1410_v1  ;;  %v1432_v8 = vld [vmem:[#allocation5 + $0xb0] sm:$0xff]  ;;  %v1434_v9 = vld [vmem:[#allocation5 + $0xb8] sm:$0xff]  ;;  %v1440_v10 = vld [vmem:[#allocation5 + $0xa0] sm:$0xff]  ;;  %s759_s27 = scalar_lea.sflag [#allocation10], %s1392_s9  ;;  %s1167_s17 = scalar_lea.hbm %s1791_s6, 512 }
  0x37   : > { %437 = vmatpush.msra.mxu1 %v1416_v3  ;;  %v1442_v11 = vld [vmem:[#allocation5 + $0xa8] sm:$0xff]  ;;  %v1446_v12 = vld [vmem:[#allocation5 + $0x90] sm:$0xff]  ;;  %v1448_v13 = vld [vmem:[#allocation5 + $0x98] sm:$0xff] }
  0x38   : > { %373 = vmatpush.msra.mxu0 %v1418_v4  ;;  %945 = vmatpush.xpose.msra.mxu2 %v1410_v1  ;;  %v1454_v14 = vld [vmem:[#allocation5 + $0x80] sm:$0xff]  ;;  %v1456_v15 = vld [vmem:[#allocation5 + $0x88] sm:$0xff]  ;;  %v1460_v16 = vld [vmem:[#allocation5 + $0x70] sm:$0xff] }
  0x39   : > { %438 = vmatpush.msra.mxu1 %v1420_v5  ;;  %961 = vmatpush.xpose.msra.mxu3 %v1416_v3  ;;  %v1462_v17 = vld [vmem:[#allocation5 + $0x78] sm:$0xff]  ;;  %v1468_v18 = vld [vmem:[#allocation5 + $0x60] sm:$0xff]  ;;  %v1470_v19 = vld [vmem:[#allocation5 + $0x68] sm:$0xff] }
  0x3a   : > { %374 = vmatpush.msra.mxu0 %v1426_v6  ;;  %v1474_v20 = vld [vmem:[#allocation5 + $0x50] sm:$0xff]  ;;  %v1476_v21 = vld [vmem:[#allocation5 + $0x58] sm:$0xff]  ;;  %v1482_v22 = vld [vmem:[#allocation5 + $0x40] sm:$0xff] }
  0x3b   : > { %439 = vmatpush.msra.mxu1 %v1428_v7  ;;  %v1484_v23 = vld [vmem:[#allocation5 + $0x48] sm:$0xff]  ;;  %v1488_v24 = vld [vmem:[#allocation5 + $0x30] sm:$0xff]  ;;  %v1490_v25 = vld [vmem:[#allocation5 + $0x38] sm:$0xff] }
  0x3c   : > { %375 = vmatpush.msra.mxu0 %v1432_v8  ;;  %946 = vmatpush.xpose.msra.mxu2 %v1418_v4  ;;  %v1496_v26 = vld [vmem:[#allocation5 + $0x20] sm:$0xff]  ;;  %v1498_v27 = vld [vmem:[#allocation5 + $0x28] sm:$0xff]  ;;  %v1502_v28 = vld [vmem:[#allocation5 + $0x10] sm:$0xff] }
  0x3d   : > { %440 = vmatpush.msra.mxu1 %v1434_v9  ;;  %962 = vmatpush.xpose.msra.mxu3 %v1420_v5  ;;  %v1504_v29 = vld [vmem:[#allocation5 + $0x18] sm:$0xff]  ;;  %v1510_v30 = vld [vmem:[#allocation5] sm:$0xff]  ;;  %v1512_v31 = vld [vmem:[#allocation5 + $0x8] sm:$0xff] }
  0x3e   : > { %376 = vmatpush.msra.mxu0 %v1440_v10  ;;  %v317_v32 = vld [vmem:[%s1398_s7] sm:$0xff]  ;;  %v318_v33 = vld [vmem:[%s1398_s7 + $0x8] sm:$0xff]  ;;  %v319_v34 = vld [vmem:[%s1398_s7 + $0x10] sm:$0xff] }
  0x3f   : > { %441 = vmatpush.msra.mxu1 %v1442_v11  ;;  %v320_v35 = vld [vmem:[%s1398_s7 + $0x18] sm:$0xff]  ;;  %v321_v36 = vld [vmem:[%s1398_s7 + $0x20] sm:$0xff]  ;;  %v322_v37 = vld [vmem:[%s1398_s7 + $0x28] sm:$0xff] }
  0x40   : > { %377 = vmatpush.msra.mxu0 %v1446_v12  ;;  %947 = vmatpush.xpose.msra.mxu2 %v1426_v6  ;;  %v323_v38 = vld [vmem:[%s1398_s7 + $0x30] sm:$0xff]  ;;  %v324_v39 = vld [vmem:[%s1398_s7 + $0x38] sm:$0xff]  ;;  %v325_v40 = vld [vmem:[%s1398_s7 + $0x40] sm:$0xff] }
  0x41   : > { %442 = vmatpush.msra.mxu1 %v1448_v13  ;;  %963 = vmatpush.xpose.msra.mxu3 %v1428_v7  ;;  %v326_v41 = vld [vmem:[%s1398_s7 + $0x48] sm:$0xff]  ;;  %v327_v42 = vld [vmem:[%s1398_s7 + $0x50] sm:$0xff]  ;;  %v328_v43 = vld [vmem:[%s1398_s7 + $0x58] sm:$0xff] }
  0x42   : > { %378 = vmatpush.msra.mxu0 %v1454_v14  ;;  %v329_v44 = vld [vmem:[%s1398_s7 + $0x60] sm:$0xff]  ;;  %v330_v45 = vld [vmem:[%s1398_s7 + $0x68] sm:$0xff]  ;;  %v331_v46 = vld [vmem:[%s1398_s7 + $0x70] sm:$0xff] }
  0x43   : > { %443 = vmatpush.msra.mxu1 %v1456_v15  ;;  %v332_v47 = vld [vmem:[%s1398_s7 + $0x78] sm:$0xff]  ;;  %v365_v48 = vld [vmem:[#allocation7] sm:$0x3]  ;;  %s791_s7 = sshll.u32 %s788_s30, 4  ;;  %s792_s7 = int_to_ptr.hbm [resolvable:$true] %s791_s7 }
  0x44   : > { %379 = vmatpush.msra.mxu0 %v1460_v16  ;;  %948 = vmatpush.xpose.msra.mxu2 %v1432_v8  ;;  %v1584_v49 = vperm.slane %v365_v48, 0  ;;  %v1586_v50 = vperm.slane %v365_v48, 1  ;;  %v533_v51 = vld [vmem:[%s1789_s4] sm:$0x3]  ;;  %s1161_s8 = sshra.s32 %s792_s7, 4  ;;  %s1162_s8 = int_to_ptr.hbm [resolvable:$true] %s1161_s8 }
  0x45   : > { %444 = vmatpush.msra.mxu1 %v1462_v17  ;;  %964 = vmatpush.xpose.msra.mxu3 %v1434_v9  ;;  %v1593_v55 = vperm.slane %v533_v51, 0  ;;  %v1596_v57 = vperm.slane %v533_v51, 1  ;;  %s1163_s14 = scalar_lea.hbm %s1162_s8, 256  ;;  %p1168_p11 = scmp.lt.s32.totalorder %s1162_s8, %s1791_s6 }
  0x46   : > { %380 = vmatpush.msra.mxu0 %v1468_v18  ;;  %p1164_p1 = scmp.ne.s32.totalorder %s1162_s8, %s1163_s14  ;;  %p1169_p2 = scmp.lt.s32.totalorder %s1167_s17, %s1163_s14 }
  0x47   : > { %445 = vmatpush.msra.mxu1 %v1470_v19 }
  0x48   : > { %381 = vmatpush.msra.mxu0 %v1474_v20  ;;  %949 = vmatpush.xpose.msra.mxu2 %v1440_v10  ;;  %p1165_p4 = pnand %p1164_p1, %p1362_p3  ;;  %p1170_p9 = por %p1169_p2, %p1168_p11 }
  0x49   : > { %446 = vmatpush.msra.mxu1 %v1476_v21  ;;  %965 = vmatpush.xpose.msra.mxu3 %v1442_v11 }
  0x4a   : > { %382 = vmatpush.msra.mxu0 %v1482_v22  ;;  %p1166_p8 = pneg %p1165_p4 }
  0x4b   : > { %447 = vmatpush.msra.mxu1 %v1484_v23 }
  0x4c   : > { %383 = vmatpush.msra.mxu0 %v1488_v24  ;;  %950 = vmatpush.xpose.msra.mxu2 %v1446_v12  ;;  %p1171_p10 = pnand %p1170_p9, %p1166_p8 }
  0x4d   : > { %448 = vmatpush.msra.mxu1 %v1490_v25  ;;  %966 = vmatpush.xpose.msra.mxu3 %v1448_v13 }
  0x4e   : > { %384 = vmatpush.msra.mxu0 %v1496_v26 }
  0x4f   : > { %449 = vmatpush.msra.mxu1 %v1498_v27 }
  0x50   : > { %385 = vmatpush.msra.mxu0 %v1502_v28  ;;  %951 = vmatpush.xpose.msra.mxu2 %v1454_v14 }
  0x51   : > { %450 = vmatpush.msra.mxu1 %v1504_v29  ;;  %967 = vmatpush.xpose.msra.mxu3 %v1456_v15 }
  0x52   : > { %386 = vmatpush.msra.mxu0 %v1510_v30 }
  0x53   : > { %451 = vmatpush.msra.mxu1 %v1512_v31  ;;  %387 = vmatmul.f32.vlgmr.msra.gmra.mxu0 %v317_v32 }
  0x54   : > { %452 = vmatmul.f32.vlgmr.msra.gmra.mxu1 %v317_v32  ;;  %575 = vmatpush.xpose.msrb.mxu0 %v1408_v0 }
  0x55   : > { %640 = vmatpush.xpose.msrb.mxu1 %v1412_v2  ;;  %952 = vmatpush.xpose.msra.mxu2 %v1460_v16 }
  0x56   : > { %968 = vmatpush.xpose.msra.mxu3 %v1462_v17 }
  0x58   : > { %576 = vmatpush.xpose.msrb.mxu0 %v1410_v1 }
  0x59   : > { %641 = vmatpush.xpose.msrb.mxu1 %v1416_v3  ;;  %953 = vmatpush.xpose.msra.mxu2 %v1468_v18 }
  0x5a   : > { %969 = vmatpush.xpose.msra.mxu3 %v1470_v19 }
  0x5b   : > { %390 = vmatmul.f32.gmra.mxu0 %v318_v33 }
  0x5c   : > { %455 = vmatmul.f32.gmra.mxu1 %v318_v33  ;;  %577 = vmatpush.xpose.msrb.mxu0 %v1418_v4 }
  0x5d   : > { %642 = vmatpush.xpose.msrb.mxu1 %v1420_v5  ;;  %954 = vmatpush.xpose.msra.mxu2 %v1474_v20 }
  0x5e   : > { %970 = vmatpush.xpose.msra.mxu3 %v1476_v21 }
  0x60   : > { %578 = vmatpush.xpose.msrb.mxu0 %v1426_v6 }
  0x61   : > { %643 = vmatpush.xpose.msrb.mxu1 %v1428_v7  ;;  %955 = vmatpush.xpose.msra.mxu2 %v1482_v22 }
  0x62   : > { %971 = vmatpush.xpose.msra.mxu3 %v1484_v23 }
  0x63   : > { %393 = vmatmul.f32.gmra.mxu0 %v319_v34 }
  0x64   : > { %458 = vmatmul.f32.gmra.mxu1 %v319_v34  ;;  %579 = vmatpush.xpose.msrb.mxu0 %v1432_v8 }
  0x65   : > { %644 = vmatpush.xpose.msrb.mxu1 %v1434_v9  ;;  %956 = vmatpush.xpose.msra.mxu2 %v1488_v24 }
  0x66   : > { %972 = vmatpush.xpose.msra.mxu3 %v1490_v25 }
  0x68   : > { %580 = vmatpush.xpose.msrb.mxu0 %v1440_v10 }
  0x69   : > { %645 = vmatpush.xpose.msrb.mxu1 %v1442_v11  ;;  %957 = vmatpush.xpose.msra.mxu2 %v1496_v26 }
  0x6a   : > { %973 = vmatpush.xpose.msra.mxu3 %v1498_v27 }
  0x6b   : > { %396 = vmatmul.f32.gmra.mxu0 %v320_v35 }
  0x6c   : > { %461 = vmatmul.f32.gmra.mxu1 %v320_v35  ;;  %581 = vmatpush.xpose.msrb.mxu0 %v1446_v12 }
  0x6d   : > { %646 = vmatpush.xpose.msrb.mxu1 %v1448_v13  ;;  %958 = vmatpush.xpose.msra.mxu2 %v1502_v28 }
  0x6e   : > { %974 = vmatpush.xpose.msra.mxu3 %v1504_v29 }
  0x70   : > { %582 = vmatpush.xpose.msrb.mxu0 %v1454_v14 }
  0x71   : > { %647 = vmatpush.xpose.msrb.mxu1 %v1456_v15  ;;  %959 = vmatpush.xpose.msra.mxu2 %v1510_v30 }
  0x72   : > { %975 = vmatpush.xpose.msra.mxu3 %v1512_v31 }
  0x73   : > { %399 = vmatmul.f32.gmra.mxu0 %v321_v36 }
  0x74   : > { %464 = vmatmul.f32.gmra.mxu1 %v321_v36  ;;  %583 = vmatpush.xpose.msrb.mxu0 %v1460_v16 }
  0x75   : > { %648 = vmatpush.xpose.msrb.mxu1 %v1462_v17 }
  0x78   : > { %584 = vmatpush.xpose.msrb.mxu0 %v1468_v18 }
  0x79   : > { %649 = vmatpush.xpose.msrb.mxu1 %v1470_v19 }
  0x7b   : > { %402 = vmatmul.f32.gmra.mxu0 %v322_v37 }
  0x7c   : > { %467 = vmatmul.f32.gmra.mxu1 %v322_v37  ;;  %585 = vmatpush.xpose.msrb.mxu0 %v1474_v20 }
  0x7d   : > { %650 = vmatpush.xpose.msrb.mxu1 %v1476_v21 }
  0x80   : > { %586 = vmatpush.xpose.msrb.mxu0 %v1482_v22 }
  0x81   : > { %651 = vmatpush.xpose.msrb.mxu1 %v1484_v23 }
  0x83   : > { %405 = vmatmul.f32.gmra.mxu0 %v323_v38 }
  0x84   : > { %470 = vmatmul.f32.gmra.mxu1 %v323_v38  ;;  %587 = vmatpush.xpose.msrb.mxu0 %v1488_v24 }
  0x85   : > { %652 = vmatpush.xpose.msrb.mxu1 %v1490_v25 }
  0x88   : > { %588 = vmatpush.xpose.msrb.mxu0 %v1496_v26 }
  0x89   : > { %653 = vmatpush.xpose.msrb.mxu1 %v1498_v27 }
  0x8b   : > { %408 = vmatmul.f32.gmra.mxu0 %v324_v39 }
  0x8c   : > { %473 = vmatmul.f32.gmra.mxu1 %v324_v39  ;;  %589 = vmatpush.xpose.msrb.mxu0 %v1502_v28 }
  0x8d   : > { %654 = vmatpush.xpose.msrb.mxu1 %v1504_v29 }
  0x90   : > { %590 = vmatpush.xpose.msrb.mxu0 %v1510_v30 }
  0x91   : > { %655 = vmatpush.xpose.msrb.mxu1 %v1512_v31 }
  0x93   : > { %411 = vmatmul.f32.gmra.mxu0 %v325_v40 }
  0x94   : > { %476 = vmatmul.f32.gmra.mxu1 %v325_v40 }
  0x9b   : > { %414 = vmatmul.f32.gmra.mxu0 %v326_v41 }
  0x9c   : > { %479 = vmatmul.f32.gmra.mxu1 %v326_v41 }
  0xa3   : > { %417 = vmatmul.f32.gmra.mxu0 %v327_v42 }
  0xa4   : > { %482 = vmatmul.f32.gmra.mxu1 %v327_v42 }
  0xab   : > { %420 = vmatmul.f32.gmra.mxu0 %v328_v43 }
  0xac   : > { %485 = vmatmul.f32.gmra.mxu1 %v328_v43 }
  0xb3   : > { %423 = vmatmul.f32.gmra.mxu0 %v329_v44 }
  0xb4   : > { %488 = vmatmul.f32.gmra.mxu1 %v329_v44 }
  0xbb   : > { %426 = vmatmul.f32.gmra.mxu0 %v330_v45 }
  0xbc   : > { %491 = vmatmul.f32.gmra.mxu1 %v330_v45 }
  0xc3   : > { %429 = vmatmul.f32.gmra.mxu0 %v331_v46 }
  0xc4   : > { %494 = vmatmul.f32.gmra.mxu1 %v331_v46 }
  0xcb   : > { %432 = vmatmul.f32.gmra.mxu0 %v332_v47 }
  0xcc   : > { %497 = vmatmul.f32.gmra.mxu1 %v332_v47 }
  0xd0   : > { %v388_v52 = vpop.f32.mrf.mxu0 }
  0xd1   : > { %v453_v53 = vpop.f32.mrf.mxu1  ;;  %v389_v54 = vadd.f32 %v388_v52, %v1584_v49 }
  0xd2   : > { %v454_v56 = vadd.f32 %v453_v53, %v1586_v50 }
  0xd3   : > { %v501_v58 = vmax.f32 %v389_v54, 0.0 }
  0xd4   : > { %v502_v59 = vmax.f32 %v454_v56, 0.0 }
  0xd5   : > { %v539_v60 = vmul.f32 %v1593_v55, %v501_v58  ;;  %721 = vst [vmem:[%s1599_s15] sm:$0xff] %v501_v58 }
  0xd6   : > { %v540_v61 = vmul.f32 %v1596_v57, %v502_v59  ;;  %722 = vst [vmem:[%s1599_s15 + $0x8] sm:$0xff] %v502_v59 }
  0xd7   : > { %591 = vmatmul.f32.vlgmr.msrb.gmra.mxu0 %v539_v60 }
  0xd8   : > { %656 = vmatmul.f32.vlgmr.msrb.gmra.mxu1 %v540_v61  ;;  %v391_v62 = vpop.f32.mrf.mxu0 }
  0xd9   : > { %v456_v63 = vpop.f32.mrf.mxu1  ;;  %v392_v0 = vadd.f32 %v391_v62, %v1584_v49 }
  0xda   : > { %v457_v1 = vadd.f32 %v456_v63, %v1586_v50 }
  0xdb   : > { %v503_v2 = vmax.f32 %v392_v0, 0.0 }
  0xdc   : > { %v504_v3 = vmax.f32 %v457_v1, 0.0 }
  0xdd   : > { %723 = vst [vmem:[%s1599_s15 + $0x10] sm:$0xff] %v503_v2  ;;  %v541_v4 = vmul.f32 %v1593_v55, %v503_v2 }
  0xde   : > { %v542_v5 = vmul.f32 %v1596_v57, %v504_v3  ;;  %724 = vst [vmem:[%s1599_s15 + $0x18] sm:$0xff] %v504_v3 }
  0xdf   : > { %594 = vmatmul.f32.gmra.mxu0 %v541_v4 }
  0xe0   : > { %659 = vmatmul.f32.gmra.mxu1 %v542_v5  ;;  %v394_v6 = vpop.f32.mrf.mxu0 }
  0xe1   : > { %v459_v7 = vpop.f32.mrf.mxu1  ;;  %v395_v8 = vadd.f32 %v394_v6, %v1584_v49 }
  0xe2   : > { %v460_v9 = vadd.f32 %v459_v7, %v1586_v50 }
  0xe3   : > { %v505_v10 = vmax.f32 %v395_v8, 0.0 }
  0xe4   : > { %v506_v11 = vmax.f32 %v460_v9, 0.0 }
  0xe5   : > { %725 = vst [vmem:[%s1599_s15 + $0x20] sm:$0xff] %v505_v10  ;;  %v543_v12 = vmul.f32 %v1593_v55, %v505_v10 }
  0xe6   : > { %v544_v13 = vmul.f32 %v1596_v57, %v506_v11  ;;  %726 = vst [vmem:[%s1599_s15 + $0x28] sm:$0xff] %v506_v11 }
  0xe7   : > { %597 = vmatmul.f32.vlgmr.msra.gmra.mxu2 %v543_v12 }
  0xe8   : > { %662 = vmatmul.f32.vlgmr.msra.gmra.mxu3 %v544_v13  ;;  %v397_v14 = vpop.f32.mrf.mxu0 }
  0xe9   : > { %v462_v15 = vpop.f32.mrf.mxu1  ;;  %v398_v16 = vadd.f32 %v397_v14, %v1584_v49 }
  0xea   : > { %v463_v17 = vadd.f32 %v462_v15, %v1586_v50 }
  0xeb   : > { %v507_v18 = vmax.f32 %v398_v16, 0.0 }
  0xec   : > { %v508_v19 = vmax.f32 %v463_v17, 0.0 }
  0xed   : > { %727 = vst [vmem:[%s1599_s15 + $0x30] sm:$0xff] %v507_v18  ;;  %v545_v20 = vmul.f32 %v1593_v55, %v507_v18 }
  0xee   : > { %v546_v21 = vmul.f32 %v1596_v57, %v508_v19  ;;  %728 = vst [vmem:[%s1599_s15 + $0x38] sm:$0xff] %v508_v19 }
  0xef   : > { %600 = vmatmul.f32.gmra.mxu2 %v545_v20 }
  0xf0   : > { %665 = vmatmul.f32.gmra.mxu3 %v546_v21  ;;  %v400_v22 = vpop.f32.mrf.mxu0 }
  0xf1   : > { %v465_v23 = vpop.f32.mrf.mxu1  ;;  %v401_v24 = vadd.f32 %v400_v22, %v1584_v49 }
  0xf2   : > { %v466_v25 = vadd.f32 %v465_v23, %v1586_v50 }
  0xf3   : > { %v509_v26 = vmax.f32 %v401_v24, 0.0 }
  0xf4   : > { %v510_v27 = vmax.f32 %v466_v25, 0.0 }
  0xf5   : > { %729 = vst [vmem:[%s1599_s15 + $0x40] sm:$0xff] %v509_v26  ;;  %v547_v28 = vmul.f32 %v1593_v55, %v509_v26 }
  0xf6   : > { %v548_v29 = vmul.f32 %v1596_v57, %v510_v27  ;;  %730 = vst [vmem:[%s1599_s15 + $0x48] sm:$0xff] %v510_v27 }
  0xf7   : > { %603 = vmatmul.f32.gmra.mxu2 %v547_v28 }
  0xf8   : > { %668 = vmatmul.f32.gmra.mxu3 %v548_v29  ;;  %v403_v30 = vpop.f32.mrf.mxu0 }
  0xf9   : > { %v468_v31 = vpop.f32.mrf.mxu1  ;;  %v404_v32 = vadd.f32 %v403_v30, %v1584_v49 }
  0xfa   : > { %v469_v33 = vadd.f32 %v468_v31, %v1586_v50 }
  0xfb   : > { %v511_v34 = vmax.f32 %v404_v32, 0.0 }
  0xfc   : > { %v512_v35 = vmax.f32 %v469_v33, 0.0 }
  0xfd   : > { %731 = vst [vmem:[%s1599_s15 + $0x50] sm:$0xff] %v511_v34  ;;  %v549_v36 = vmul.f32 %v1593_v55, %v511_v34 }
  0xfe   : > { %v550_v37 = vmul.f32 %v1596_v57, %v512_v35  ;;  %732 = vst [vmem:[%s1599_s15 + $0x58] sm:$0xff] %v512_v35 }
  0xff   : > { %606 = vmatmul.f32.gmra.mxu2 %v549_v36 }
 0x100   : > { %671 = vmatmul.f32.gmra.mxu3 %v550_v37  ;;  %v406_v38 = vpop.f32.mrf.mxu0 }
 0x101   : > { %v471_v39 = vpop.f32.mrf.mxu1  ;;  %v407_v40 = vadd.f32 %v406_v38, %v1584_v49 }
 0x102   : > { %v472_v41 = vadd.f32 %v471_v39, %v1586_v50 }
 0x103   : > { %v513_v42 = vmax.f32 %v407_v40, 0.0 }
 0x104   : > { %v514_v43 = vmax.f32 %v472_v41, 0.0 }
 0x105   : > { %733 = vst [vmem:[%s1599_s15 + $0x60] sm:$0xff] %v513_v42  ;;  %v551_v44 = vmul.f32 %v1593_v55, %v513_v42 }
 0x106   : > { %v552_v45 = vmul.f32 %v1596_v57, %v514_v43  ;;  %734 = vst [vmem:[%s1599_s15 + $0x68] sm:$0xff] %v514_v43 }
 0x107   : > { %609 = vmatmul.f32.gmra.mxu2 %v551_v44 }
 0x108   : > { %674 = vmatmul.f32.gmra.mxu3 %v552_v45  ;;  %v409_v46 = vpop.f32.mrf.mxu0 }
 0x109   : > { %v474_v47 = vpop.f32.mrf.mxu1  ;;  %v410_v48 = vadd.f32 %v409_v46, %v1584_v49 }
 0x10a   : > { %v475_v51 = vadd.f32 %v474_v47, %v1586_v50 }
 0x10b   : > { %v515_v52 = vmax.f32 %v410_v48, 0.0 }
 0x10c   : > { %v516_v53 = vmax.f32 %v475_v51, 0.0 }
 0x10d   : > { %735 = vst [vmem:[%s1599_s15 + $0x70] sm:$0xff] %v515_v52  ;;  %v553_v54 = vmul.f32 %v1593_v55, %v515_v52 }
 0x10e   : > { %v554_v56 = vmul.f32 %v1596_v57, %v516_v53  ;;  %736 = vst [vmem:[%s1599_s15 + $0x78] sm:$0xff] %v516_v53 }
 0x10f   : > { %612 = vmatmul.f32.gmra.mxu2 %v553_v54 }
 0x110   : > { %677 = vmatmul.f32.gmra.mxu3 %v554_v56  ;;  %v412_v58 = vpop.f32.mrf.mxu0 }
 0x111   : > { %v477_v59 = vpop.f32.mrf.mxu1  ;;  %v413_v60 = vadd.f32 %v412_v58, %v1584_v49 }
 0x112   : > { %v478_v61 = vadd.f32 %v477_v59, %v1586_v50 }
 0x113   : > { %v517_v62 = vmax.f32 %v413_v60, 0.0 }
 0x114   : > { %v518_v63 = vmax.f32 %v478_v61, 0.0 }
 0x115   : > { %737 = vst [vmem:[%s1599_s15 + $0x80] sm:$0xff] %v517_v62  ;;  %v555_v0 = vmul.f32 %v1593_v55, %v517_v62  ;;  %v1697_v62 = vld [vmem:[%s1788_s3] ss:$0 sm:$0xff] }
 0x116   : > { %v556_v1 = vmul.f32 %v1596_v57, %v518_v63  ;;  %738 = vst [vmem:[%s1599_s15 + $0x88] sm:$0xff] %v518_v63 }
 0x117   : > { %615 = vmatmul.f32.gmra.mxu2 %v555_v0 }
 0x118   : > { %680 = vmatmul.f32.gmra.mxu3 %v556_v1  ;;  %v415_v2 = vpop.f32.mrf.mxu0 }
 0x119   : > { %v480_v3 = vpop.f32.mrf.mxu1  ;;  %v416_v4 = vadd.f32 %v415_v2, %v1584_v49 }
 0x11a   : > { %v481_v5 = vadd.f32 %v480_v3, %v1586_v50 }
 0x11b   : > { %v519_v6 = vmax.f32 %v416_v4, 0.0 }
 0x11c   : > { %v520_v7 = vmax.f32 %v481_v5, 0.0 }
 0x11d   : > { %739 = vst [vmem:[%s1599_s15 + $0x90] sm:$0xff] %v519_v6  ;;  %v557_v8 = vmul.f32 %v1593_v55, %v519_v6 }
 0x11e   : > { %v558_v9 = vmul.f32 %v1596_v57, %v520_v7  ;;  %740 = vst [vmem:[%s1599_s15 + $0x98] sm:$0xff] %v520_v7 }
 0x11f   : > { %618 = vmatmul.f32.gmra.mxu2 %v557_v8 }
 0x120   : > { %683 = vmatmul.f32.gmra.mxu3 %v558_v9  ;;  %v418_v10 = vpop.f32.mrf.mxu0 }
 0x121   : > { %v483_v11 = vpop.f32.mrf.mxu1  ;;  %v419_v12 = vadd.f32 %v418_v10, %v1584_v49 }
 0x122   : > { %v484_v13 = vadd.f32 %v483_v11, %v1586_v50 }
 0x123   : > { %v521_v14 = vmax.f32 %v419_v12, 0.0 }
 0x124   : > { %v522_v15 = vmax.f32 %v484_v13, 0.0 }
 0x125   : > { %741 = vst [vmem:[%s1599_s15 + $0xa0] sm:$0xff] %v521_v14  ;;  %v559_v16 = vmul.f32 %v1593_v55, %v521_v14 }
 0x126   : > { %v560_v17 = vmul.f32 %v1596_v57, %v522_v15  ;;  %742 = vst [vmem:[%s1599_s15 + $0xa8] sm:$0xff] %v522_v15 }
 0x127   : > { %621 = vmatmul.f32.gmra.mxu2 %v559_v16 }
 0x128   : > { %686 = vmatmul.f32.gmra.mxu3 %v560_v17  ;;  %v421_v18 = vpop.f32.mrf.mxu0 }
 0x129   : > { %v486_v19 = vpop.f32.mrf.mxu1  ;;  %v422_v20 = vadd.f32 %v421_v18, %v1584_v49 }
 0x12a   : > { %v487_v21 = vadd.f32 %v486_v19, %v1586_v50 }
 0x12b   : > { %v523_v22 = vmax.f32 %v422_v20, 0.0 }
 0x12c   : > { %v524_v23 = vmax.f32 %v487_v21, 0.0 }
 0x12d   : > { %743 = vst [vmem:[%s1599_s15 + $0xb0] sm:$0xff] %v523_v22  ;;  %v561_v24 = vmul.f32 %v1593_v55, %v523_v22 }
 0x12e   : > { %v562_v25 = vmul.f32 %v1596_v57, %v524_v23  ;;  %744 = vst [vmem:[%s1599_s15 + $0xb8] sm:$0xff] %v524_v23 }
 0x12f   : > { %624 = vmatmul.f32.gmra.mxu2 %v561_v24 }
 0x130   : > { %689 = vmatmul.f32.gmra.mxu3 %v562_v25  ;;  %v424_v26 = vpop.f32.mrf.mxu0 }
 0x131   : > { %v489_v27 = vpop.f32.mrf.mxu1  ;;  %v425_v28 = vadd.f32 %v424_v26, %v1584_v49 }
 0x132   : > { %v490_v29 = vadd.f32 %v489_v27, %v1586_v50 }
 0x133   : > { %v525_v30 = vmax.f32 %v425_v28, 0.0 }
 0x134   : > { %v526_v31 = vmax.f32 %v490_v29, 0.0 }
 0x135   : > { %745 = vst [vmem:[%s1599_s15 + $0xc0] sm:$0xff] %v525_v30  ;;  %v563_v32 = vmul.f32 %v1593_v55, %v525_v30 }
 0x136   : > { %v564_v33 = vmul.f32 %v1596_v57, %v526_v31  ;;  %746 = vst [vmem:[%s1599_s15 + $0xc8] sm:$0xff] %v526_v31 }
 0x137   : > { %627 = vmatmul.f32.gmra.mxu2 %v563_v32 }
 0x138   : > { %692 = vmatmul.f32.gmra.mxu3 %v564_v33  ;;  %v427_v34 = vpop.f32.mrf.mxu0 }
 0x139   : > { %v492_v35 = vpop.f32.mrf.mxu1  ;;  %v428_v36 = vadd.f32 %v427_v34, %v1584_v49 }
 0x13a   : > { %v493_v37 = vadd.f32 %v492_v35, %v1586_v50 }
 0x13b   : > { %v527_v38 = vmax.f32 %v428_v36, 0.0 }
 0x13c   : > { %v528_v39 = vmax.f32 %v493_v37, 0.0 }
 0x13d   : > { %747 = vst [vmem:[%s1599_s15 + $0xd0] sm:$0xff] %v527_v38  ;;  %v565_v40 = vmul.f32 %v1593_v55, %v527_v38 }
 0x13e   : > { %v566_v41 = vmul.f32 %v1596_v57, %v528_v39  ;;  %748 = vst [vmem:[%s1599_s15 + $0xd8] sm:$0xff] %v528_v39 }
 0x13f   : > { %630 = vmatmul.f32.gmra.mxu2 %v565_v40 }
 0x140   : > { %695 = vmatmul.f32.gmra.mxu3 %v566_v41  ;;  %v430_v42 = vpop.f32.mrf.mxu0 }
 0x141   : > { %v495_v43 = vpop.f32.mrf.mxu1  ;;  %v431_v44 = vadd.f32 %v430_v42, %v1584_v49 }
 0x142   : > { %v496_v45 = vadd.f32 %v495_v43, %v1586_v50 }
 0x143   : > { %v529_v46 = vmax.f32 %v431_v44, 0.0 }
 0x144   : > { %v530_v47 = vmax.f32 %v496_v45, 0.0 }
 0x145   : > { %749 = vst [vmem:[%s1599_s15 + $0xe0] sm:$0xff] %v529_v46  ;;  %v567_v48 = vmul.f32 %v1593_v55, %v529_v46 }
 0x146   : > { %v568_v51 = vmul.f32 %v1596_v57, %v530_v47  ;;  %750 = vst [vmem:[%s1599_s15 + $0xe8] sm:$0xff] %v530_v47 }
 0x147   : > { %633 = vmatmul.f32.gmra.mxu2 %v567_v48 }
 0x148   : > { %698 = vmatmul.f32.gmra.mxu3 %v568_v51  ;;  %v433_v52 = vpop.f32.mrf.mxu0 }
 0x149   : > { %v498_v53 = vpop.f32.mrf.mxu1  ;;  %v434_v54 = vadd.f32 %v433_v52, %v1584_v49 }
 0x14a   : > { %v499_v56 = vadd.f32 %v498_v53, %v1586_v50 }
 0x14b   : > { %v531_v58 = vmax.f32 %v434_v54, 0.0 }
 0x14c   : > { %v532_v59 = vmax.f32 %v499_v56, 0.0 }
 0x14d   : > { %751 = vst [vmem:[%s1599_s15 + $0xf0] sm:$0xff] %v531_v58  ;;  %v569_v60 = vmul.f32 %v1593_v55, %v531_v58 }
 0x14e   : > { %v570_v61 = vmul.f32 %v1596_v57, %v532_v59  ;;  %752 = vst [vmem:[%s1599_s15 + $0xf8] sm:$0xff] %v532_v59 }
 0x14f   : > { %636 = vmatmul.f32.gmra.mxu2 %v569_v60 }
 0x150   : > { %701 = vmatmul.f32.gmra.mxu3 %v570_v61 }
 0x154   : > { %v592_v49 = vpop.f32.mrf.mxu0 }
 0x155   : > { %v657_v50 = vpop.f32.mrf.mxu1  ;;  %v593_v63 = vadd.f32 %v1697_v62, %v592_v49 }
 0x157   : > { %v658_v0 = vadd.f32 %v657_v50, %v593_v63 }
 0x159   : > { %705 = vst [vmem:[%s1706_s13] sm:$0xff] %v658_v0 }
 0x15c   : > { %v595_v55 = vpop.f32.mrf.mxu0 }
 0x15d   : > { %v660_v57 = vpop.f32.mrf.mxu1  ;;  %v596_v1 = vadd.f32 %v1697_v62, %v595_v55 }
 0x15e   : > { %1174 = shalt.err (!%p1171_p10)
}
 0x15f   : > { %s1257_s11 = smov 256   ;;  %s1258_s12 = smov 16   ;;  %v661_v2 = vadd.f32 %v660_v57, %v596_v1 }
 0x160   : > { %987 = dma.vmem_to_hbm [thread:$0]  (%p1362_p3), %s790_s20, 4096, %s792_s7, %s759_s27, %s1257_s11, %s1257_s11, %s1258_s12  }
 0x161   : > { %706 = vst [vmem:[%s1706_s13 + $0x8] sm:$0xff] %v661_v2  ;;  %s941_s30 = sshll.u32 %s1317_s25, 7  ;;  %s771_s8 = sshll.u32 %s1706_s13, 4  ;;  %s772_s8 = int_to_ptr.vmem [resolvable:$true] %s771_s8 }
 0x162   : > { %s770_s27 = scalar_lea.hbm %s1790_s5, %s941_s30  ;;  %s754_s19 = scalar_lea.sflag [#allocation4], %s1392_s9 }
 0x163   : > { %s773_s14 = sshll.u32 %s770_s27, 4  ;;  %s1195_s10 = scalar_lea.hbm %s1790_s5, 256  ;;  %s774_s14 = int_to_ptr.hbm [resolvable:$true] %s773_s14 }
 0x164   : > { %s1189_s16 = sshra.s32 %s774_s14, 4  ;;  %s1190_s16 = int_to_ptr.hbm [resolvable:$true] %s1189_s16 }
 0x165   : > { %s1191_s25 = scalar_lea.hbm %s1190_s16, 128  ;;  %p1196_p5 = scmp.lt.s32.totalorder %s1190_s16, %s1790_s5 }
 0x166   : > { %p1192_p12 = scmp.ne.s32.totalorder %s1190_s16, %s1191_s25  ;;  %p1197_p7 = scmp.lt.s32.totalorder %s1195_s10, %s1191_s25 }
 0x168   : > { %p1193_p13 = pnand %p1192_p12, %p1362_p3  ;;  %p1198_p1 = por %p1197_p7, %p1196_p5 }
 0x16a   : > { %v598_v3 = vpop.f32.mrf.mxu2  ;;  %p1194_p0 = pneg %p1193_p13 }
 0x16b   : > { %v663_v4 = vpop.f32.mrf.mxu3  ;;  %v599_v5 = vadd.f32 %v1697_v62, %v598_v3 }
 0x16c   : > { %p1199_p4 = pnand %p1198_p1, %p1194_p0 }
 0x16d   : > { %v664_v6 = vadd.f32 %v663_v4, %v599_v5 }
 0x16f   : > { %707 = vst [vmem:[%s1706_s13 + $0x10] sm:$0xff] %v664_v6 }
 0x172   : > { %v601_v7 = vpop.f32.mrf.mxu2 }
 0x173   : > { %v666_v8 = vpop.f32.mrf.mxu3  ;;  %v602_v9 = vadd.f32 %v1697_v62, %v601_v7 }
 0x175   : > { %v667_v10 = vadd.f32 %v666_v8, %v602_v9 }
 0x177   : > { %708 = vst [vmem:[%s1706_s13 + $0x18] sm:$0xff] %v667_v10 }
 0x17a   : > { %v604_v11 = vpop.f32.mrf.mxu2 }
 0x17b   : > { %v669_v12 = vpop.f32.mrf.mxu3  ;;  %v605_v13 = vadd.f32 %v1697_v62, %v604_v11 }
 0x17d   : > { %v670_v14 = vadd.f32 %v669_v12, %v605_v13 }
 0x17f   : > { %709 = vst [vmem:[%s1706_s13 + $0x20] sm:$0xff] %v670_v14 }
 0x182   : > { %v607_v15 = vpop.f32.mrf.mxu2 }
 0x183   : > { %v672_v16 = vpop.f32.mrf.mxu3  ;;  %v608_v17 = vadd.f32 %v1697_v62, %v607_v15 }
 0x185   : > { %v673_v18 = vadd.f32 %v672_v16, %v608_v17 }
 0x187   : > { %710 = vst [vmem:[%s1706_s13 + $0x28] sm:$0xff] %v673_v18 }
 0x18a   : > { %v610_v19 = vpop.f32.mrf.mxu2 }
 0x18b   : > { %v675_v20 = vpop.f32.mrf.mxu3  ;;  %v611_v21 = vadd.f32 %v1697_v62, %v610_v19 }
 0x18d   : > { %v676_v22 = vadd.f32 %v675_v20, %v611_v21 }
 0x18f   : > { %711 = vst [vmem:[%s1706_s13 + $0x30] sm:$0xff] %v676_v22 }
 0x192   : > { %v613_v23 = vpop.f32.mrf.mxu2 }
 0x193   : > { %v678_v24 = vpop.f32.mrf.mxu3  ;;  %v614_v25 = vadd.f32 %v1697_v62, %v613_v23 }
 0x195   : > { %v679_v26 = vadd.f32 %v678_v24, %v614_v25 }
 0x197   : > { %712 = vst [vmem:[%s1706_s13 + $0x38] sm:$0xff] %v679_v26 }
 0x19a   : > { %v616_v27 = vpop.f32.mrf.mxu2 }
 0x19b   : > { %v681_v28 = vpop.f32.mrf.mxu3  ;;  %v617_v29 = vadd.f32 %v1697_v62, %v616_v27 }
 0x19d   : > { %v682_v30 = vadd.f32 %v681_v28, %v617_v29 }
 0x19f   : > { %713 = vst [vmem:[%s1706_s13 + $0x40] sm:$0xff] %v682_v30 }
 0x1a2   : > { %v619_v31 = vpop.f32.mrf.mxu2 }
 0x1a3   : > { %v684_v32 = vpop.f32.mrf.mxu3  ;;  %v620_v33 = vadd.f32 %v1697_v62, %v619_v31 }
 0x1a5   : > { %v685_v34 = vadd.f32 %v684_v32, %v620_v33 }
 0x1a7   : > { %714 = vst [vmem:[%s1706_s13 + $0x48] sm:$0xff] %v685_v34 }
 0x1aa   : > { %v622_v35 = vpop.f32.mrf.mxu2 }
 0x1ab   : > { %v687_v36 = vpop.f32.mrf.mxu3  ;;  %v623_v37 = vadd.f32 %v1697_v62, %v622_v35 }
 0x1ad   : > { %v688_v38 = vadd.f32 %v687_v36, %v623_v37 }
 0x1af   : > { %715 = vst [vmem:[%s1706_s13 + $0x50] sm:$0xff] %v688_v38 }
 0x1b2   : > { %v625_v39 = vpop.f32.mrf.mxu2 }
 0x1b3   : > { %v690_v40 = vpop.f32.mrf.mxu3  ;;  %v626_v41 = vadd.f32 %v1697_v62, %v625_v39 }
 0x1b5   : > { %v691_v42 = vadd.f32 %v690_v40, %v626_v41 }
 0x1b7   : > { %716 = vst [vmem:[%s1706_s13 + $0x58] sm:$0xff] %v691_v42 }
 0x1ba   : > { %v628_v43 = vpop.f32.mrf.mxu2 }
 0x1bb   : > { %v693_v44 = vpop.f32.mrf.mxu3  ;;  %v629_v45 = vadd.f32 %v1697_v62, %v628_v43 }
 0x1bd   : > { %v694_v46 = vadd.f32 %v693_v44, %v629_v45 }
 0x1bf   : > { %717 = vst [vmem:[%s1706_s13 + $0x60] sm:$0xff] %v694_v46 }
 0x1c2   : > { %v631_v47 = vpop.f32.mrf.mxu2 }
 0x1c3   : > { %v696_v48 = vpop.f32.mrf.mxu3  ;;  %v632_v51 = vadd.f32 %v1697_v62, %v631_v47 }
 0x1c5   : > { %v697_v52 = vadd.f32 %v696_v48, %v632_v51 }
 0x1c7   : > { %718 = vst [vmem:[%s1706_s13 + $0x68] sm:$0xff] %v697_v52 }
 0x1ca   : > { %v634_v53 = vpop.f32.mrf.mxu2 }
 0x1cb   : > { %v699_v54 = vpop.f32.mrf.mxu3  ;;  %v635_v56 = vadd.f32 %v1697_v62, %v634_v53 }
 0x1cd   : > { %v700_v58 = vadd.f32 %v699_v54, %v635_v56 }
 0x1cf   : > { %719 = vst [vmem:[%s1706_s13 + $0x70] sm:$0xff] %v700_v58 }
 0x1d2   : > { %v637_v59 = vpop.f32.mrf.mxu2 }
 0x1d3   : > { %v702_v60 = vpop.f32.mrf.mxu3  ;;  %v638_v61 = vadd.f32 %v1697_v62, %v637_v59 }
 0x1d5   : > { %v703_v49 = vadd.f32 %v702_v60, %v638_v61 }
 0x1d7   : > { %720 = vst [vmem:[%s1706_s13 + $0x78] sm:$0xff] %v703_v49 }
 0x1d8   : > { %1202 = shalt.err (!%p1199_p4)
}
 0x1d9   : > { %s1259_s9 = smov 128   ;;  %s1260_s13 = smov 8  }
 0x1da   : > { %986 = dma.vmem_to_hbm [thread:$0]  (%p1362_p3), %s772_s8, 2048, %s774_s14, %s754_s19, %s1259_s9, %s1259_s9, %s1260_s13  }
 0x1db PF: > { %s806_s30 = sand.u32 1, %s1237_s21   ;;  %p1797_p8 = scmp.ge.s32.totalorder %s1249_s24, 2 }
 0x1dc   : > { %s807_s20 = scalar_lea.sflag [#allocation4], %s806_s30 }
 0x1dd   : > { %p1002_p11 = pnand %p1797_p8, %p1331_p6 }
 0x1df   : > { %p1003_p2 = pneg %p1002_p11 }
 0x1e1   : > { %1228 = dma.done.wait (%p1003_p2), %s807_s20, 2048  }
 0x1e2   : > { %1230 = vsyncadd (%p1003_p2), %s807_s20, 4294965248  ;;  %s817_s7 = scalar_lea.sflag [#allocation10], %s806_s30 }
 0x1e3   : > { %1232 = dma.done.wait (%p1003_p2), %s817_s7, 4096  }
 0x1e4   : > { %1234 = vsyncadd (%p1003_p2), %s817_s7, 4294963200  ;;  %p24_p3 = scmp.ge.s32.totalorder %s1352_s18, 4   ;;  %s1798_s21 = smov %s1241_s22 }
 0x1e5   : > { %s1799_s22 = smov %s1245_s23  ;;  %s1800_s23 = smov %s1368_s29 }
 0x1e6   : > { %s1801_s24 = smov %s1352_s18  ;;  %26 = sbr.rel (!%p24_p3) target bundleno = 8 (0x8), region = 110 }
 0x1eb   :  { %823 = vsyncpa [#allocation3], 1 }
 0x1ec   :  { %825 = vsyncpa [#allocation3 + $0x1], 1 }
 0x1ed   :  { %826 = vsyncpa [#allocation6], 1 }
 0x1ee   :  { %827 = vsyncpa [#allocation4], 1 }
 0x1ef   :  { %829 = vsyncpa [#allocation4 + $0x1], 1 }
 0x1f0   :  { %830 = vsyncpa [#allocation10], 1 }
 0x1f1   :  { %832 = vsyncpa [#allocation10 + $0x1], 1 }

// kernel: tpu_custom_call.1
= control target key start
LH: loop header
LB: loop body
LE: loop exit
PB: predicated region body
PF: predicated region fallthrough
CT: control target
= control target key end

     0   :  { %12 = vsyncpa [#allocation3], 0  ;;  %s1785_s0 = inlined_call_operand.hbm [shape: f32[256,128], index: 0, kind: input, shape index: {}]   ;;  %s1786_s1 = inlined_call_operand.hbm [shape: f32[128,256], index: 1, kind: input, shape index: {}]   ;;  %s1787_s2 = inlined_call_operand.hbm [shape: f32[1,256], index: 2, kind: input, shape index: {}]   ;;  %s1788_s3 = inlined_call_operand.vmem [shape: f32[1,128], index: 3, kind: input, shape index: {}]   ;;  %s1789_s4 = inlined_call_operand.vmem [shape: f32[1,256], index: 4, kind: input, shape index: {}]   ;;  %s1790_s5 = inlined_call_operand.hbm [shape: f32[256,128], index: 5, kind: output, shape index: {0}]   ;;  %s1791_s6 = inlined_call_operand.hbm [shape: f32[256,256], index: 6, kind: output, shape index: {1}]  }
   0x1   :  { %14 = vsyncpa [#allocation3 + $0x1], 0 }
   0x2   :  { %15 = vsyncpa [#allocation6], 0 }
   0x3   :  { %16 = vsyncpa [#allocation4], 0 }
   0x4   :  { %18 = vsyncpa [#allocation4 + $0x1], 0 }
   0x5   :  { %19 = vsyncpa [#allocation10], 0 }
   0x6   :  { %21 = vsyncpa [#allocation10 + $0x1], 0  ;;  %s1296_s21 = smov 0   ;;  %s1298_s22 = smov 0  }
   0x7   :  { %s1300_s23 = smov 0   ;;  %s1302_s24 = smov 0  }
   0x8 LB: > { %s1317_s25 = sadd.s32 4294967295, %s1249_s24   ;;  %s917_s26 = sadd.s32 4294967294, %s1249_s24   ;;  %s1249_s24 = sphi %s1302_s24, %s1801_s24   ;;  %s1245_s23 = sphi %s1300_s23, %s1800_s23   ;;  %s1241_s22 = sphi %s1298_s22, %s1799_s22   ;;  %s1237_s21 = sphi %s1296_s21, %s1798_s21  }
   0x9   : > { %p47_p0 = scmp.ne.s32.totalorder %s1241_s22, %s1237_s21  ;;  %p48_p1 = scmp.eq.s32.totalorder %s1317_s25, 0 }
   0xa   : > { %p155_p2 = scmp.eq.s32.totalorder %s1317_s25, 1  ;;  %p161_p3 = scmp.eq.s32.totalorder %s917_s26, 1 }
   0xb   : > { %p1326_p4 = por %p48_p1, %p47_p0  ;;  %p918_p5 = scmp.ge.s32.totalorder %s1249_s24, 1 }
   0xc   : > { %p1331_p6 = por %p161_p3, %p47_p0  ;;  %p194_p7 = scmp.lt.s32.totalorder %s1249_s24, 3 }
   0xd   : > { %s205_s7 = sshll.u32 %s1786_s1, 4  ;;  %s1251_s9 = smov [#allocation5]   ;;  %s206_s7 = int_to_ptr.hbm [resolvable:$true] %s205_s7 }
   0xe   : > { %p1339_p8 = pnand %p918_p5, %p194_p7  ;;  %s207_s10 = sshll.u32 %s1251_s9, 4  ;;  %s208_s10 = int_to_ptr.vmem [resolvable:$true] %s207_s10 }
   0xf   : > { %s220_s13 = sshll.u32 %s1787_s2, 4  ;;  %s1252_s14 = smov 256   ;;  %s221_s13 = int_to_ptr.hbm [resolvable:$true] %s220_s13 }
  0x10   : > { %p990_p9 = pneg %p1339_p8  ;;  %s1253_s15 = smov 16  }
  0x11   : > { %s1254_s16 = smov [#allocation7]   ;;  %s1352_s18 = sadd.s32 1, %s1249_s24  }
  0x12   : > { %p991_p10 = pnand %p990_p9, %p48_p1  ;;  %s222_s17 = sshll.u32 %s1254_s16, 4  ;;  %s223_s17 = int_to_ptr.vmem [resolvable:$true] %s222_s17 }
  0x13   : > { %s34_s19 = sadd.s32 1, %s1245_s23  ;;  %s31_s20 = ssub.s32 %s1249_s24, %s1352_s18 }
  0x14   : > { %993 = dma.hbm_to_vmem [thread:$0]  (!%p991_p10), %s206_s7, 4096, %s208_s10, [#allocation6], %s1252_s14, %s1252_s14, %s1253_s15  }
  0x15   : > { %996 = dma.hbm_to_vmem [thread:$0]  (!%p991_p10), %s221_s13, 32, %s223_s17, [#allocation6]  }
  0x16   : > { %p41_p12 = scmp.ne.s32.totalorder %s1245_s23, %s1241_s22  ;;  %p32_p13 = scmp.eq.s32.totalorder %s31_s20, 0 }
  0x17   : > { %p42_p0 = scmp.eq.s32.totalorder %s1249_s24, 0  ;;  %p1010_p5 = scmp.lt.s32.totalorder %s1249_s24, 2 }
  0x18   : > { %p1362_p3 = por %p155_p2, %p41_p12  ;;  %s239_s30 = sand.u32 1, %s1245_s23  }
  0x19   : > { %s1368_s29 = scalar_select %p32_p13, %s1245_s23, %s34_s19  }
  0x1a   : > { %p43_p7 = por %p42_p0, %p41_p12  ;;  %s922_s7 = sshll.u32 %s239_s30, 7 }
  0x1b   : > { %s940_s9 = sshll.u32 %s1249_s24, 7  ;;  %s243_s13 = scalar_lea.vmem [#allocation2], %s922_s7 }
  0x1c   : > { %s248_s12 = scalar_lea.hbm %s1785_s0, %s940_s9  ;;  %s251_s14 = sshll.u32 %s243_s13, 4  ;;  %s252_s14 = int_to_ptr.vmem [resolvable:$true] %s251_s14 }
  0x1d   : > { %s249_s15 = sshll.u32 %s248_s12, 4  ;;  %p1375_p2 = pnand %p1010_p5, %p43_p7  ;;  %s250_s15 = int_to_ptr.hbm [resolvable:$true] %s249_s15 }
  0x1e   : > { %s240_s17 = scalar_lea.sflag [#allocation3], %s239_s30  ;;  %s1117_s19 = sshra.s32 %s250_s15, 4  ;;  %s1118_s19 = int_to_ptr.hbm [resolvable:$true] %s1117_s19 }
  0x1f   : > { %s1119_s20 = scalar_lea.hbm %s1118_s19, 128  ;;  %p1121_p10 = pneg %p1375_p2 }
  0x20   : > { %p1120_p9 = scmp.ne.s32.totalorder %s1118_s19, %s1119_s20  ;;  %s1124_s10 = scalar_lea.hbm %s1785_s0, 256 }
  0x21   : > { %p1125_p0 = scmp.lt.s32.totalorder %s1118_s19, %s1785_s0  ;;  %p1126_p5 = scmp.lt.s32.totalorder %s1124_s10, %s1119_s20 }
  0x22   : > { %p1122_p12 = pnand %p1121_p10, %p1120_p9 }
  0x23   : > { %p1127_p7 = por %p1126_p5, %p1125_p0 }
  0x24   : > { %p1123_p13 = pneg %p1122_p12 }
  0x26   : > { %p1128_p11 = pnand %p1127_p7, %p1123_p13 }
  0x28   : > { %1131 = shalt.err (!%p1128_p11)
}
  0x29   : > { %s1255_s30 = smov 128   ;;  %s1256_s13 = smov 8  }
  0x2a   : > { %1000 = dma.hbm_to_vmem [thread:$0]  (!%p1375_p2), %s250_s15, 2048, %s252_s14, %s240_s17, %s1255_s30, %s1255_s30, %s1256_s13  }
  0x2b   : > { %263 = sbr.rel (%p1339_p8) target bundleno = 475 (0x1db), region = 40  ;;  %s1392_s9 = sand.u32 (!%p1339_p8), 1, %s1241_s22  }
  0x2c   : > { %s926_s19 = sshll.u32 (!%p1339_p8), %s1392_s9, 7  ;;  %s266_s20 = scalar_lea.sflag (!%p1339_p8), [#allocation3], %s1392_s9 }
  0x2d   : > { %s1398_s7 = scalar_lea.vmem (!%p1339_p8), [#allocation2], %s926_s19 }
  0x30   : > { %1220 = dma.done.wait (%p1326_p4), %s266_s20, 2048  }
  0x31   : > { %1222 = vsyncadd (%p1326_p4), %s266_s20, 4294965248 }
  0x32   : > { %1224 = dma.done.wait (%p48_p1), [#allocation6], 4128  }
  0x33   : > { %1226 = vsyncadd (%p48_p1), [#allocation6], 4294963168  ;;  %v1408_v0 = vld [vmem:[#allocation5 + $0xf0] sm:$0xff]  ;;  %v1410_v1 = vld [vmem:[#allocation5 + $0xe0] sm:$0xff]  ;;  %s930_s14 = sshll.u32 %s1392_s9, 8  ;;  %s943_s10 = sshll.u32 %s1317_s25, 8 }
  0x34   : > { %v1412_v2 = vld [vmem:[#allocation5 + $0xf8] sm:$0xff]  ;;  %371 = vmatpush.msra.mxu0 %v1408_v0  ;;  %v1416_v3 = vld [vmem:[#allocation5 + $0xe8] sm:$0xff]  ;;  %v1418_v4 = vld [vmem:[#allocation5 + $0xd0] sm:$0xff]  ;;  %944 = vmatpush.xpose.msra.mxu2 %v1408_v0  ;;  %s1599_s15 = scalar_lea.vmem [#allocation9], %s930_s14  ;;  %s788_s30 = scalar_lea.hbm %s1791_s6, %s943_s10 }
  0x35   : > { %436 = vmatpush.msra.mxu1 %v1412_v2  ;;  %v1420_v5 = vld [vmem:[#allocation5 + $0xd8] sm:$0xff]  ;;  %960 = vmatpush.xpose.msra.mxu3 %v1412_v2  ;;  %v1426_v6 = vld [vmem:[#allocation5 + $0xc0] sm:$0xff]  ;;  %v1428_v7 = vld [vmem:[#allocation5 + $0xc8] sm:$0xff]  ;;  %s1706_s13 = scalar_lea.vmem [#allocation8], %s926_s19  ;;  %s789_s20 = sshll.u32 %s1599_s15, 4  ;;  %s790_s20 = int_to_ptr.vmem [resolvable:$true] %s789_s20 }
  0x36   : > { %372 = vmatpush.msra.mxu0 %v1410_v1  ;;  %v1432_v8 = vld [vmem:[#allocation5 + $0xb0] sm:$0xff]  ;;  %v1434_v9 = vld [vmem:[#allocation5 + $0xb8] sm:$0xff]  ;;  %v1440_v10 = vld [vmem:[#allocation5 + $0xa0] sm:$0xff]  ;;  %s759_s27 = scalar_lea.sflag [#allocation10], %s1392_s9  ;;  %s1167_s17 = scalar_lea.hbm %s1791_s6, 512 }
  0x37   : > { %437 = vmatpush.msra.mxu1 %v1416_v3  ;;  %v1442_v11 = vld [vmem:[#allocation5 + $0xa8] sm:$0xff]  ;;  %v1446_v12 = vld [vmem:[#allocation5 + $0x90] sm:$0xff]  ;;  %v1448_v13 = vld [vmem:[#allocation5 + $0x98] sm:$0xff] }
  0x38   : > { %373 = vmatpush.msra.mxu0 %v1418_v4  ;;  %945 = vmatpush.xpose.msra.mxu2 %v1410_v1  ;;  %v1454_v14 = vld [vmem:[#allocation5 + $0x80] sm:$0xff]  ;;  %v1456_v15 = vld [vmem:[#allocation5 + $0x88] sm:$0xff]  ;;  %v1460_v16 = vld [vmem:[#allocation5 + $0x70] sm:$0xff] }
  0x39   : > { %438 = vmatpush.msra.mxu1 %v1420_v5  ;;  %961 = vmatpush.xpose.msra.mxu3 %v1416_v3  ;;  %v1462_v17 = vld [vmem:[#allocation5 + $0x78] sm:$0xff]  ;;  %v1468_v18 = vld [vmem:[#allocation5 + $0x60] sm:$0xff]  ;;  %v1470_v19 = vld [vmem:[#allocation5 + $0x68] sm:$0xff] }
  0x3a   : > { %374 = vmatpush.msra.mxu0 %v1426_v6  ;;  %v1474_v20 = vld [vmem:[#allocation5 + $0x50] sm:$0xff]  ;;  %v1476_v21 = vld [vmem:[#allocation5 + $0x58] sm:$0xff]  ;;  %v1482_v22 = vld [vmem:[#allocation5 + $0x40] sm:$0xff] }
  0x3b   : > { %439 = vmatpush.msra.mxu1 %v1428_v7  ;;  %v1484_v23 = vld [vmem:[#allocation5 + $0x48] sm:$0xff]  ;;  %v1488_v24 = vld [vmem:[#allocation5 + $0x30] sm:$0xff]  ;;  %v1490_v25 = vld [vmem:[#allocation5 + $0x38] sm:$0xff] }
  0x3c   : > { %375 = vmatpush.msra.mxu0 %v1432_v8  ;;  %946 = vmatpush.xpose.msra.mxu2 %v1418_v4  ;;  %v1496_v26 = vld [vmem:[#allocation5 + $0x20] sm:$0xff]  ;;  %v1498_v27 = vld [vmem:[#allocation5 + $0x28] sm:$0xff]  ;;  %v1502_v28 = vld [vmem:[#allocation5 + $0x10] sm:$0xff] }
  0x3d   : > { %440 = vmatpush.msra.mxu1 %v1434_v9  ;;  %962 = vmatpush.xpose.msra.mxu3 %v1420_v5  ;;  %v1504_v29 = vld [vmem:[#allocation5 + $0x18] sm:$0xff]  ;;  %v1510_v30 = vld [vmem:[#allocation5] sm:$0xff]  ;;  %v1512_v31 = vld [vmem:[#allocation5 + $0x8] sm:$0xff] }
  0x3e   : > { %376 = vmatpush.msra.mxu0 %v1440_v10  ;;  %v317_v32 = vld [vmem:[%s1398_s7] sm:$0xff]  ;;  %v318_v33 = vld [vmem:[%s1398_s7 + $0x8] sm:$0xff]  ;;  %v319_v34 = vld [vmem:[%s1398_s7 + $0x10] sm:$0xff] }
  0x3f   : > { %441 = vmatpush.msra.mxu1 %v1442_v11  ;;  %v320_v35 = vld [vmem:[%s1398_s7 + $0x18] sm:$0xff]  ;;  %v321_v36 = vld [vmem:[%s1398_s7 + $0x20] sm:$0xff]  ;;  %v322_v37 = vld [vmem:[%s1398_s7 + $0x28] sm:$0xff] }
  0x40   : > { %377 = vmatpush.msra.mxu0 %v1446_v12  ;;  %947 = vmatpush.xpose.msra.mxu2 %v1426_v6  ;;  %v323_v38 = vld [vmem:[%s1398_s7 + $0x30] sm:$0xff]  ;;  %v324_v39 = vld [vmem:[%s1398_s7 + $0x38] sm:$0xff]  ;;  %v325_v40 = vld [vmem:[%s1398_s7 + $0x40] sm:$0xff] }
  0x41   : > { %442 = vmatpush.msra.mxu1 %v1448_v13  ;;  %963 = vmatpush.xpose.msra.mxu3 %v1428_v7  ;;  %v326_v41 = vld [vmem:[%s1398_s7 + $0x48] sm:$0xff]  ;;  %v327_v42 = vld [vmem:[%s1398_s7 + $0x50] sm:$0xff]  ;;  %v328_v43 = vld [vmem:[%s1398_s7 + $0x58] sm:$0xff] }
  0x42   : > { %378 = vmatpush.msra.mxu0 %v1454_v14  ;;  %v329_v44 = vld [vmem:[%s1398_s7 + $0x60] sm:$0xff]  ;;  %v330_v45 = vld [vmem:[%s1398_s7 + $0x68] sm:$0xff]  ;;  %v331_v46 = vld [vmem:[%s1398_s7 + $0x70] sm:$0xff] }
  0x43   : > { %443 = vmatpush.msra.mxu1 %v1456_v15  ;;  %v332_v47 = vld [vmem:[%s1398_s7 + $0x78] sm:$0xff]  ;;  %v365_v48 = vld [vmem:[#allocation7] sm:$0x3]  ;;  %s791_s7 = sshll.u32 %s788_s30, 4  ;;  %s792_s7 = int_to_ptr.hbm [resolvable:$true] %s791_s7 }
  0x44   : > { %379 = vmatpush.msra.mxu0 %v1460_v16  ;;  %948 = vmatpush.xpose.msra.mxu2 %v1432_v8  ;;  %v1584_v49 = vperm.slane %v365_v48, 0  ;;  %v1586_v50 = vperm.slane %v365_v48, 1  ;;  %v533_v51 = vld [vmem:[%s1789_s4] sm:$0x3]  ;;  %s1161_s8 = sshra.s32 %s792_s7, 4  ;;  %s1162_s8 = int_to_ptr.hbm [resolvable:$true] %s1161_s8 }
  0x45   : > { %444 = vmatpush.msra.mxu1 %v1462_v17  ;;  %964 = vmatpush.xpose.msra.mxu3 %v1434_v9  ;;  %v1593_v55 = vperm.slane %v533_v51, 0  ;;  %v1596_v57 = vperm.slane %v533_v51, 1  ;;  %s1163_s14 = scalar_lea.hbm %s1162_s8, 256  ;;  %p1168_p11 = scmp.lt.s32.totalorder %s1162_s8, %s1791_s6 }
  0x46   : > { %380 = vmatpush.msra.mxu0 %v1468_v18  ;;  %p1164_p1 = scmp.ne.s32.totalorder %s1162_s8, %s1163_s14  ;;  %p1169_p2 = scmp.lt.s32.totalorder %s1167_s17, %s1163_s14 }
  0x47   : > { %445 = vmatpush.msra.mxu1 %v1470_v19 }
  0x48   : > { %381 = vmatpush.msra.mxu0 %v1474_v20  ;;  %949 = vmatpush.xpose.msra.mxu2 %v1440_v10  ;;  %p1165_p4 = pnand %p1164_p1, %p1362_p3  ;;  %p1170_p9 = por %p1169_p2, %p1168_p11 }
  0x49   : > { %446 = vmatpush.msra.mxu1 %v1476_v21  ;;  %965 = vmatpush.xpose.msra.mxu3 %v1442_v11 }
  0x4a   : > { %382 = vmatpush.msra.mxu0 %v1482_v22  ;;  %p1166_p8 = pneg %p1165_p4 }
  0x4b   : > { %447 = vmatpush.msra.mxu1 %v1484_v23 }
  0x4c   : > { %383 = vmatpush.msra.mxu0 %v1488_v24  ;;  %950 = vmatpush.xpose.msra.mxu2 %v1446_v12  ;;  %p1171_p10 = pnand %p1170_p9, %p1166_p8 }
  0x4d   : > { %448 = vmatpush.msra.mxu1 %v1490_v25  ;;  %966 = vmatpush.xpose.msra.mxu3 %v1448_v13 }
  0x4e   : > { %384 = vmatpush.msra.mxu0 %v1496_v26 }
  0x4f   : > { %449 = vmatpush.msra.mxu1 %v1498_v27 }
  0x50   : > { %385 = vmatpush.msra.mxu0 %v1502_v28  ;;  %951 = vmatpush.xpose.msra.mxu2 %v1454_v14 }
  0x51   : > { %450 = vmatpush.msra.mxu1 %v1504_v29  ;;  %967 = vmatpush.xpose.msra.mxu3 %v1456_v15 }
  0x52   : > { %386 = vmatpush.msra.mxu0 %v1510_v30 }
  0x53   : > { %451 = vmatpush.msra.mxu1 %v1512_v31  ;;  %387 = vmatmul.f32.vlgmr.msra.gmra.mxu0 %v317_v32 }
  0x54   : > { %452 = vmatmul.f32.vlgmr.msra.gmra.mxu1 %v317_v32  ;;  %575 = vmatpush.xpose.msrb.mxu0 %v1408_v0 }
  0x55   : > { %640 = vmatpush.xpose.msrb.mxu1 %v1412_v2  ;;  %952 = vmatpush.xpose.msra.mxu2 %v1460_v16 }
  0x56   : > { %968 = vmatpush.xpose.msra.mxu3 %v1462_v17 }
  0x58   : > { %576 = vmatpush.xpose.msrb.mxu0 %v1410_v1 }
  0x59   : > { %641 = vmatpush.xpose.msrb.mxu1 %v1416_v3  ;;  %953 = vmatpush.xpose.msra.mxu2 %v1468_v18 }
  0x5a   : > { %969 = vmatpush.xpose.msra.mxu3 %v1470_v19 }
  0x5b   : > { %390 = vmatmul.f32.gmra.mxu0 %v318_v33 }
  0x5c   : > { %455 = vmatmul.f32.gmra.mxu1 %v318_v33  ;;  %577 = vmatpush.xpose.msrb.mxu0 %v1418_v4 }
  0x5d   : > { %642 = vmatpush.xpose.msrb.mxu1 %v1420_v5  ;;  %954 = vmatpush.xpose.msra.mxu2 %v1474_v20 }
  0x5e   : > { %970 = vmatpush.xpose.msra.mxu3 %v1476_v21 }
  0x60   : > { %578 = vmatpush.xpose.msrb.mxu0 %v1426_v6 }
  0x61   : > { %643 = vmatpush.xpose.msrb.mxu1 %v1428_v7  ;;  %955 = vmatpush.xpose.msra.mxu2 %v1482_v22 }
  0x62   : > { %971 = vmatpush.xpose.msra.mxu3 %v1484_v23 }
  0x63   : > { %393 = vmatmul.f32.gmra.mxu0 %v319_v34 }
  0x64   : > { %458 = vmatmul.f32.gmra.mxu1 %v319_v34  ;;  %579 = vmatpush.xpose.msrb.mxu0 %v1432_v8 }
  0x65   : > { %644 = vmatpush.xpose.msrb.mxu1 %v1434_v9  ;;  %956 = vmatpush.xpose.msra.mxu2 %v1488_v24 }
  0x66   : > { %972 = vmatpush.xpose.msra.mxu3 %v1490_v25 }
  0x68   : > { %580 = vmatpush.xpose.msrb.mxu0 %v1440_v10 }
  0x69   : > { %645 = vmatpush.xpose.msrb.mxu1 %v1442_v11  ;;  %957 = vmatpush.xpose.msra.mxu2 %v1496_v26 }
  0x6a   : > { %973 = vmatpush.xpose.msra.mxu3 %v1498_v27 }
  0x6b   : > { %396 = vmatmul.f32.gmra.mxu0 %v320_v35 }
  0x6c   : > { %461 = vmatmul.f32.gmra.mxu1 %v320_v35  ;;  %581 = vmatpush.xpose.msrb.mxu0 %v1446_v12 }
  0x6d   : > { %646 = vmatpush.xpose.msrb.mxu1 %v1448_v13  ;;  %958 = vmatpush.xpose.msra.mxu2 %v1502_v28 }
  0x6e   : > { %974 = vmatpush.xpose.msra.mxu3 %v1504_v29 }
  0x70   : > { %582 = vmatpush.xpose.msrb.mxu0 %v1454_v14 }
  0x71   : > { %647 = vmatpush.xpose.msrb.mxu1 %v1456_v15  ;;  %959 = vmatpush.xpose.msra.mxu2 %v1510_v30 }
  0x72   : > { %975 = vmatpush.xpose.msra.mxu3 %v1512_v31 }
  0x73   : > { %399 = vmatmul.f32.gmra.mxu0 %v321_v36 }
  0x74   : > { %464 = vmatmul.f32.gmra.mxu1 %v321_v36  ;;  %583 = vmatpush.xpose.msrb.mxu0 %v1460_v16 }
  0x75   : > { %648 = vmatpush.xpose.msrb.mxu1 %v1462_v17 }
  0x78   : > { %584 = vmatpush.xpose.msrb.mxu0 %v1468_v18 }
  0x79   : > { %649 = vmatpush.xpose.msrb.mxu1 %v1470_v19 }
  0x7b   : > { %402 = vmatmul.f32.gmra.mxu0 %v322_v37 }
  0x7c   : > { %467 = vmatmul.f32.gmra.mxu1 %v322_v37  ;;  %585 = vmatpush.xpose.msrb.mxu0 %v1474_v20 }
  0x7d   : > { %650 = vmatpush.xpose.msrb.mxu1 %v1476_v21 }
  0x80   : > { %586 = vmatpush.xpose.msrb.mxu0 %v1482_v22 }
  0x81   : > { %651 = vmatpush.xpose.msrb.mxu1 %v1484_v23 }
  0x83   : > { %405 = vmatmul.f32.gmra.mxu0 %v323_v38 }
  0x84   : > { %470 = vmatmul.f32.gmra.mxu1 %v323_v38  ;;  %587 = vmatpush.xpose.msrb.mxu0 %v1488_v24 }
  0x85   : > { %652 = vmatpush.xpose.msrb.mxu1 %v1490_v25 }
  0x88   : > { %588 = vmatpush.xpose.msrb.mxu0 %v1496_v26 }
  0x89   : > { %653 = vmatpush.xpose.msrb.mxu1 %v1498_v27 }
  0x8b   : > { %408 = vmatmul.f32.gmra.mxu0 %v324_v39 }
  0x8c   : > { %473 = vmatmul.f32.gmra.mxu1 %v324_v39  ;;  %589 = vmatpush.xpose.msrb.mxu0 %v1502_v28 }
  0x8d   : > { %654 = vmatpush.xpose.msrb.mxu1 %v1504_v29 }
  0x90   : > { %590 = vmatpush.xpose.msrb.mxu0 %v1510_v30 }
  0x91   : > { %655 = vmatpush.xpose.msrb.mxu1 %v1512_v31 }
  0x93   : > { %411 = vmatmul.f32.gmra.mxu0 %v325_v40 }
  0x94   : > { %476 = vmatmul.f32.gmra.mxu1 %v325_v40 }
  0x9b   : > { %414 = vmatmul.f32.gmra.mxu0 %v326_v41 }
  0x9c   : > { %479 = vmatmul.f32.gmra.mxu1 %v326_v41 }
  0xa3   : > { %417 = vmatmul.f32.gmra.mxu0 %v327_v42 }
  0xa4   : > { %482 = vmatmul.f32.gmra.mxu1 %v327_v42 }
  0xab   : > { %420 = vmatmul.f32.gmra.mxu0 %v328_v43 }
  0xac   : > { %485 = vmatmul.f32.gmra.mxu1 %v328_v43 }
  0xb3   : > { %423 = vmatmul.f32.gmra.mxu0 %v329_v44 }
  0xb4   : > { %488 = vmatmul.f32.gmra.mxu1 %v329_v44 }
  0xbb   : > { %426 = vmatmul.f32.gmra.mxu0 %v330_v45 }
  0xbc   : > { %491 = vmatmul.f32.gmra.mxu1 %v330_v45 }
  0xc3   : > { %429 = vmatmul.f32.gmra.mxu0 %v331_v46 }
  0xc4   : > { %494 = vmatmul.f32.gmra.mxu1 %v331_v46 }
  0xcb   : > { %432 = vmatmul.f32.gmra.mxu0 %v332_v47 }
  0xcc   : > { %497 = vmatmul.f32.gmra.mxu1 %v332_v47 }
  0xd0   : > { %v388_v52 = vpop.f32.mrf.mxu0 }
  0xd1   : > { %v453_v53 = vpop.f32.mrf.mxu1  ;;  %v389_v54 = vadd.f32 %v388_v52, %v1584_v49 }
  0xd2   : > { %v454_v56 = vadd.f32 %v453_v53, %v1586_v50 }
  0xd3   : > { %v501_v58 = vmax.f32 %v389_v54, 0.0 }
  0xd4   : > { %v502_v59 = vmax.f32 %v454_v56, 0.0 }
  0xd5   : > { %v539_v60 = vmul.f32 %v1593_v55, %v501_v58  ;;  %721 = vst [vmem:[%s1599_s15] sm:$0xff] %v501_v58 }
  0xd6   : > { %v540_v61 = vmul.f32 %v1596_v57, %v502_v59  ;;  %722 = vst [vmem:[%s1599_s15 + $0x8] sm:$0xff] %v502_v59 }
  0xd7   : > { %591 = vmatmul.f32.vlgmr.msrb.gmra.mxu0 %v539_v60 }
  0xd8   : > { %656 = vmatmul.f32.vlgmr.msrb.gmra.mxu1 %v540_v61  ;;  %v391_v62 = vpop.f32.mrf.mxu0 }
  0xd9   : > { %v456_v63 = vpop.f32.mrf.mxu1  ;;  %v392_v0 = vadd.f32 %v391_v62, %v1584_v49 }
  0xda   : > { %v457_v1 = vadd.f32 %v456_v63, %v1586_v50 }
  0xdb   : > { %v503_v2 = vmax.f32 %v392_v0, 0.0 }
  0xdc   : > { %v504_v3 = vmax.f32 %v457_v1, 0.0 }
  0xdd   : > { %723 = vst [vmem:[%s1599_s15 + $0x10] sm:$0xff] %v503_v2  ;;  %v541_v4 = vmul.f32 %v1593_v55, %v503_v2 }
  0xde   : > { %v542_v5 = vmul.f32 %v1596_v57, %v504_v3  ;;  %724 = vst [vmem:[%s1599_s15 + $0x18] sm:$0xff] %v504_v3 }
  0xdf   : > { %594 = vmatmul.f32.gmra.mxu0 %v541_v4 }
  0xe0   : > { %659 = vmatmul.f32.gmra.mxu1 %v542_v5  ;;  %v394_v6 = vpop.f32.mrf.mxu0 }
  0xe1   : > { %v459_v7 = vpop.f32.mrf.mxu1  ;;  %v395_v8 = vadd.f32 %v394_v6, %v1584_v49 }
  0xe2   : > { %v460_v9 = vadd.f32 %v459_v7, %v1586_v50 }
  0xe3   : > { %v505_v10 = vmax.f32 %v395_v8, 0.0 }
  0xe4   : > { %v506_v11 = vmax.f32 %v460_v9, 0.0 }
  0xe5   : > { %725 = vst [vmem:[%s1599_s15 + $0x20] sm:$0xff] %v505_v10  ;;  %v543_v12 = vmul.f32 %v1593_v55, %v505_v10 }
  0xe6   : > { %v544_v13 = vmul.f32 %v1596_v57, %v506_v11  ;;  %726 = vst [vmem:[%s1599_s15 + $0x28] sm:$0xff] %v506_v11 }
  0xe7   : > { %597 = vmatmul.f32.vlgmr.msra.gmra.mxu2 %v543_v12 }
  0xe8   : > { %662 = vmatmul.f32.vlgmr.msra.gmra.mxu3 %v544_v13  ;;  %v397_v14 = vpop.f32.mrf.mxu0 }
  0xe9   : > { %v462_v15 = vpop.f32.mrf.mxu1  ;;  %v398_v16 = vadd.f32 %v397_v14, %v1584_v49 }
  0xea   : > { %v463_v17 = vadd.f32 %v462_v15, %v1586_v50 }
  0xeb   : > { %v507_v18 = vmax.f32 %v398_v16, 0.0 }
  0xec   : > { %v508_v19 = vmax.f32 %v463_v17, 0.0 }
  0xed   : > { %727 = vst [vmem:[%s1599_s15 + $0x30] sm:$0xff] %v507_v18  ;;  %v545_v20 = vmul.f32 %v1593_v55, %v507_v18 }
  0xee   : > { %v546_v21 = vmul.f32 %v1596_v57, %v508_v19  ;;  %728 = vst [vmem:[%s1599_s15 + $0x38] sm:$0xff] %v508_v19 }
  0xef   : > { %600 = vmatmul.f32.gmra.mxu2 %v545_v20 }
  0xf0   : > { %665 = vmatmul.f32.gmra.mxu3 %v546_v21  ;;  %v400_v22 = vpop.f32.mrf.mxu0 }
  0xf1   : > { %v465_v23 = vpop.f32.mrf.mxu1  ;;  %v401_v24 = vadd.f32 %v400_v22, %v1584_v49 }
  0xf2   : > { %v466_v25 = vadd.f32 %v465_v23, %v1586_v50 }
  0xf3   : > { %v509_v26 = vmax.f32 %v401_v24, 0.0 }
  0xf4   : > { %v510_v27 = vmax.f32 %v466_v25, 0.0 }
  0xf5   : > { %729 = vst [vmem:[%s1599_s15 + $0x40] sm:$0xff] %v509_v26  ;;  %v547_v28 = vmul.f32 %v1593_v55, %v509_v26 }
  0xf6   : > { %v548_v29 = vmul.f32 %v1596_v57, %v510_v27  ;;  %730 = vst [vmem:[%s1599_s15 + $0x48] sm:$0xff] %v510_v27 }
  0xf7   : > { %603 = vmatmul.f32.gmra.mxu2 %v547_v28 }
  0xf8   : > { %668 = vmatmul.f32.gmra.mxu3 %v548_v29  ;;  %v403_v30 = vpop.f32.mrf.mxu0 }
  0xf9   : > { %v468_v31 = vpop.f32.mrf.mxu1  ;;  %v404_v32 = vadd.f32 %v403_v30, %v1584_v49 }
  0xfa   : > { %v469_v33 = vadd.f32 %v468_v31, %v1586_v50 }
  0xfb   : > { %v511_v34 = vmax.f32 %v404_v32, 0.0 }
  0xfc   : > { %v512_v35 = vmax.f32 %v469_v33, 0.0 }
  0xfd   : > { %731 = vst [vmem:[%s1599_s15 + $0x50] sm:$0xff] %v511_v34  ;;  %v549_v36 = vmul.f32 %v1593_v55, %v511_v34 }
  0xfe   : > { %v550_v37 = vmul.f32 %v1596_v57, %v512_v35  ;;  %732 = vst [vmem:[%s1599_s15 + $0x58] sm:$0xff] %v512_v35 }
  0xff   : > { %606 = vmatmul.f32.gmra.mxu2 %v549_v36 }
 0x100   : > { %671 = vmatmul.f32.gmra.mxu3 %v550_v37  ;;  %v406_v38 = vpop.f32.mrf.mxu0 }
 0x101   : > { %v471_v39 = vpop.f32.mrf.mxu1  ;;  %v407_v40 = vadd.f32 %v406_v38, %v1584_v49 }
 0x102   : > { %v472_v41 = vadd.f32 %v471_v39, %v1586_v50 }
 0x103   : > { %v513_v42 = vmax.f32 %v407_v40, 0.0 }
 0x104   : > { %v514_v43 = vmax.f32 %v472_v41, 0.0 }
 0x105   : > { %733 = vst [vmem:[%s1599_s15 + $0x60] sm:$0xff] %v513_v42  ;;  %v551_v44 = vmul.f32 %v1593_v55, %v513_v42 }
 0x106   : > { %v552_v45 = vmul.f32 %v1596_v57, %v514_v43  ;;  %734 = vst [vmem:[%s1599_s15 + $0x68] sm:$0xff] %v514_v43 }
 0x107   : > { %609 = vmatmul.f32.gmra.mxu2 %v551_v44 }
 0x108   : > { %674 = vmatmul.f32.gmra.mxu3 %v552_v45  ;;  %v409_v46 = vpop.f32.mrf.mxu0 }
 0x109   : > { %v474_v47 = vpop.f32.mrf.mxu1  ;;  %v410_v48 = vadd.f32 %v409_v46, %v1584_v49 }
 0x10a   : > { %v475_v51 = vadd.f32 %v474_v47, %v1586_v50 }
 0x10b   : > { %v515_v52 = vmax.f32 %v410_v48, 0.0 }
 0x10c   : > { %v516_v53 = vmax.f32 %v475_v51, 0.0 }
 0x10d   : > { %735 = vst [vmem:[%s1599_s15 + $0x70] sm:$0xff] %v515_v52  ;;  %v553_v54 = vmul.f32 %v1593_v55, %v515_v52 }
 0x10e   : > { %v554_v56 = vmul.f32 %v1596_v57, %v516_v53  ;;  %736 = vst [vmem:[%s1599_s15 + $0x78] sm:$0xff] %v516_v53 }
 0x10f   : > { %612 = vmatmul.f32.gmra.mxu2 %v553_v54 }
 0x110   : > { %677 = vmatmul.f32.gmra.mxu3 %v554_v56  ;;  %v412_v58 = vpop.f32.mrf.mxu0 }
 0x111   : > { %v477_v59 = vpop.f32.mrf.mxu1  ;;  %v413_v60 = vadd.f32 %v412_v58, %v1584_v49 }
 0x112   : > { %v478_v61 = vadd.f32 %v477_v59, %v1586_v50 }
 0x113   : > { %v517_v62 = vmax.f32 %v413_v60, 0.0 }
 0x114   : > { %v518_v63 = vmax.f32 %v478_v61, 0.0 }
 0x115   : > { %737 = vst [vmem:[%s1599_s15 + $0x80] sm:$0xff] %v517_v62  ;;  %v555_v0 = vmul.f32 %v1593_v55, %v517_v62  ;;  %v1697_v62 = vld [vmem:[%s1788_s3] ss:$0 sm:$0xff] }
 0x116   : > { %v556_v1 = vmul.f32 %v1596_v57, %v518_v63  ;;  %738 = vst [vmem:[%s1599_s15 + $0x88] sm:$0xff] %v518_v63 }
 0x117   : > { %615 = vmatmul.f32.gmra.mxu2 %v555_v0 }
 0x118   : > { %680 = vmatmul.f32.gmra.mxu3 %v556_v1  ;;  %v415_v2 = vpop.f32.mrf.mxu0 }
 0x119   : > { %v480_v3 = vpop.f32.mrf.mxu1  ;;  %v416_v4 = vadd.f32 %v415_v2, %v1584_v49 }
 0x11a   : > { %v481_v5 = vadd.f32 %v480_v3, %v1586_v50 }
 0x11b   : > { %v519_v6 = vmax.f32 %v416_v4, 0.0 }
 0x11c   : > { %v520_v7 = vmax.f32 %v481_v5, 0.0 }
 0x11d   : > { %739 = vst [vmem:[%s1599_s15 + $0x90] sm:$0xff] %v519_v6  ;;  %v557_v8 = vmul.f32 %v1593_v55, %v519_v6 }
 0x11e   : > { %v558_v9 = vmul.f32 %v1596_v57, %v520_v7  ;;  %740 = vst [vmem:[%s1599_s15 + $0x98] sm:$0xff] %v520_v7 }
 0x11f   : > { %618 = vmatmul.f32.gmra.mxu2 %v557_v8 }
 0x120   : > { %683 = vmatmul.f32.gmra.mxu3 %v558_v9  ;;  %v418_v10 = vpop.f32.mrf.mxu0 }
 0x121   : > { %v483_v11 = vpop.f32.mrf.mxu1  ;;  %v419_v12 = vadd.f32 %v418_v10, %v1584_v49 }
 0x122   : > { %v484_v13 = vadd.f32 %v483_v11, %v1586_v50 }
 0x123   : > { %v521_v14 = vmax.f32 %v419_v12, 0.0 }
 0x124   : > { %v522_v15 = vmax.f32 %v484_v13, 0.0 }
 0x125   : > { %741 = vst [vmem:[%s1599_s15 + $0xa0] sm:$0xff] %v521_v14  ;;  %v559_v16 = vmul.f32 %v1593_v55, %v521_v14 }
 0x126   : > { %v560_v17 = vmul.f32 %v1596_v57, %v522_v15  ;;  %742 = vst [vmem:[%s1599_s15 + $0xa8] sm:$0xff] %v522_v15 }
 0x127   : > { %621 = vmatmul.f32.gmra.mxu2 %v559_v16 }
 0x128   : > { %686 = vmatmul.f32.gmra.mxu3 %v560_v17  ;;  %v421_v18 = vpop.f32.mrf.mxu0 }
 0x129   : > { %v486_v19 = vpop.f32.mrf.mxu1  ;;  %v422_v20 = vadd.f32 %v421_v18, %v1584_v49 }
 0x12a   : > { %v487_v21 = vadd.f32 %v486_v19, %v1586_v50 }
 0x12b   : > { %v523_v22 = vmax.f32 %v422_v20, 0.0 }
 0x12c   : > { %v524_v23 = vmax.f32 %v487_v21, 0.0 }
 0x12d   : > { %743 = vst [vmem:[%s1599_s15 + $0xb0] sm:$0xff] %v523_v22  ;;  %v561_v24 = vmul.f32 %v1593_v55, %v523_v22 }
 0x12e   : > { %v562_v25 = vmul.f32 %v1596_v57, %v524_v23  ;;  %744 = vst [vmem:[%s1599_s15 + $0xb8] sm:$0xff] %v524_v23 }
 0x12f   : > { %624 = vmatmul.f32.gmra.mxu2 %v561_v24 }
 0x130   : > { %689 = vmatmul.f32.gmra.mxu3 %v562_v25  ;;  %v424_v26 = vpop.f32.mrf.mxu0 }
 0x131   : > { %v489_v27 = vpop.f32.mrf.mxu1  ;;  %v425_v28 = vadd.f32 %v424_v26, %v1584_v49 }
 0x132   : > { %v490_v29 = vadd.f32 %v489_v27, %v1586_v50 }
 0x133   : > { %v525_v30 = vmax.f32 %v425_v28, 0.0 }
 0x134   : > { %v526_v31 = vmax.f32 %v490_v29, 0.0 }
 0x135   : > { %745 = vst [vmem:[%s1599_s15 + $0xc0] sm:$0xff] %v525_v30  ;;  %v563_v32 = vmul.f32 %v1593_v55, %v525_v30 }
 0x136   : > { %v564_v33 = vmul.f32 %v1596_v57, %v526_v31  ;;  %746 = vst [vmem:[%s1599_s15 + $0xc8] sm:$0xff] %v526_v31 }
 0x137   : > { %627 = vmatmul.f32.gmra.mxu2 %v563_v32 }
 0x138   : > { %692 = vmatmul.f32.gmra.mxu3 %v564_v33  ;;  %v427_v34 = vpop.f32.mrf.mxu0 }
 0x139   : > { %v492_v35 = vpop.f32.mrf.mxu1  ;;  %v428_v36 = vadd.f32 %v427_v34, %v1584_v49 }
 0x13a   : > { %v493_v37 = vadd.f32 %v492_v35, %v1586_v50 }
 0x13b   : > { %v527_v38 = vmax.f32 %v428_v36, 0.0 }
 0x13c   : > { %v528_v39 = vmax.f32 %v493_v37, 0.0 }
 0x13d   : > { %747 = vst [vmem:[%s1599_s15 + $0xd0] sm:$0xff] %v527_v38  ;;  %v565_v40 = vmul.f32 %v1593_v55, %v527_v38 }
 0x13e   : > { %v566_v41 = vmul.f32 %v1596_v57, %v528_v39  ;;  %748 = vst [vmem:[%s1599_s15 + $0xd8] sm:$0xff] %v528_v39 }
 0x13f   : > { %630 = vmatmul.f32.gmra.mxu2 %v565_v40 }
 0x140   : > { %695 = vmatmul.f32.gmra.mxu3 %v566_v41  ;;  %v430_v42 = vpop.f32.mrf.mxu0 }
 0x141   : > { %v495_v43 = vpop.f32.mrf.mxu1  ;;  %v431_v44 = vadd.f32 %v430_v42, %v1584_v49 }
 0x142   : > { %v496_v45 = vadd.f32 %v495_v43, %v1586_v50 }
 0x143   : > { %v529_v46 = vmax.f32 %v431_v44, 0.0 }
 0x144   : > { %v530_v47 = vmax.f32 %v496_v45, 0.0 }
 0x145   : > { %749 = vst [vmem:[%s1599_s15 + $0xe0] sm:$0xff] %v529_v46  ;;  %v567_v48 = vmul.f32 %v1593_v55, %v529_v46 }
 0x146   : > { %v568_v51 = vmul.f32 %v1596_v57, %v530_v47  ;;  %750 = vst [vmem:[%s1599_s15 + $0xe8] sm:$0xff] %v530_v47 }
 0x147   : > { %633 = vmatmul.f32.gmra.mxu2 %v567_v48 }
 0x148   : > { %698 = vmatmul.f32.gmra.mxu3 %v568_v51  ;;  %v433_v52 = vpop.f32.mrf.mxu0 }
 0x149   : > { %v498_v53 = vpop.f32.mrf.mxu1  ;;  %v434_v54 = vadd.f32 %v433_v52, %v1584_v49 }
 0x14a   : > { %v499_v56 = vadd.f32 %v498_v53, %v1586_v50 }
 0x14b   : > { %v531_v58 = vmax.f32 %v434_v54, 0.0 }
 0x14c   : > { %v532_v59 = vmax.f32 %v499_v56, 0.0 }
 0x14d   : > { %751 = vst [vmem:[%s1599_s15 + $0xf0] sm:$0xff] %v531_v58  ;;  %v569_v60 = vmul.f32 %v1593_v55, %v531_v58 }
 0x14e   : > { %v570_v61 = vmul.f32 %v1596_v57, %v532_v59  ;;  %752 = vst [vmem:[%s1599_s15 + $0xf8] sm:$0xff] %v532_v59 }
 0x14f   : > { %636 = vmatmul.f32.gmra.mxu2 %v569_v60 }
 0x150   : > { %701 = vmatmul.f32.gmra.mxu3 %v570_v61 }
 0x154   : > { %v592_v49 = vpop.f32.mrf.mxu0 }
 0x155   : > { %v657_v50 = vpop.f32.mrf.mxu1  ;;  %v593_v63 = vadd.f32 %v1697_v62, %v592_v49 }
 0x157   : > { %v658_v0 = vadd.f32 %v657_v50, %v593_v63 }
 0x159   : > { %705 = vst [vmem:[%s1706_s13] sm:$0xff] %v658_v0 }
 0x15c   : > { %v595_v55 = vpop.f32.mrf.mxu0 }
 0x15d   : > { %v660_v57 = vpop.f32.mrf.mxu1  ;;  %v596_v1 = vadd.f32 %v1697_v62, %v595_v55 }
 0x15e   : > { %1174 = shalt.err (!%p1171_p10)
}
 0x15f   : > { %s1257_s11 = smov 256   ;;  %s1258_s12 = smov 16   ;;  %v661_v2 = vadd.f32 %v660_v57, %v596_v1 }
 0x160   : > { %987 = dma.vmem_to_hbm [thread:$0]  (%p1362_p3), %s790_s20, 4096, %s792_s7, %s759_s27, %s1257_s11, %s1257_s11, %s1258_s12  }
 0x161   : > { %706 = vst [vmem:[%s1706_s13 + $0x8] sm:$0xff] %v661_v2  ;;  %s941_s30 = sshll.u32 %s1317_s25, 7  ;;  %s771_s8 = sshll.u32 %s1706_s13, 4  ;;  %s772_s8 = int_to_ptr.vmem [resolvable:$true] %s771_s8 }
 0x162   : > { %s770_s27 = scalar_lea.hbm %s1790_s5, %s941_s30  ;;  %s754_s19 = scalar_lea.sflag [#allocation4], %s1392_s9 }
 0x163   : > { %s773_s14 = sshll.u32 %s770_s27, 4  ;;  %s1195_s10 = scalar_lea.hbm %s1790_s5, 256  ;;  %s774_s14 = int_to_ptr.hbm [resolvable:$true] %s773_s14 }
 0x164   : > { %s1189_s16 = sshra.s32 %s774_s14, 4  ;;  %s1190_s16 = int_to_ptr.hbm [resolvable:$true] %s1189_s16 }
 0x165   : > { %s1191_s25 = scalar_lea.hbm %s1190_s16, 128  ;;  %p1196_p5 = scmp.lt.s32.totalorder %s1190_s16, %s1790_s5 }
 0x166   : > { %p1192_p12 = scmp.ne.s32.totalorder %s1190_s16, %s1191_s25  ;;  %p1197_p7 = scmp.lt.s32.totalorder %s1195_s10, %s1191_s25 }
 0x168   : > { %p1193_p13 = pnand %p1192_p12, %p1362_p3  ;;  %p1198_p1 = por %p1197_p7, %p1196_p5 }
 0x16a   : > { %v598_v3 = vpop.f32.mrf.mxu2  ;;  %p1194_p0 = pneg %p1193_p13 }
 0x16b   : > { %v663_v4 = vpop.f32.mrf.mxu3  ;;  %v599_v5 = vadd.f32 %v1697_v62, %v598_v3 }
 0x16c   : > { %p1199_p4 = pnand %p1198_p1, %p1194_p0 }
 0x16d   : > { %v664_v6 = vadd.f32 %v663_v4, %v599_v5 }
 0x16f   : > { %707 = vst [vmem:[%s1706_s13 + $0x10] sm:$0xff] %v664_v6 }
 0x172   : > { %v601_v7 = vpop.f32.mrf.mxu2 }
 0x173   : > { %v666_v8 = vpop.f32.mrf.mxu3  ;;  %v602_v9 = vadd.f32 %v1697_v62, %v601_v7 }
 0x175   : > { %v667_v10 = vadd.f32 %v666_v8, %v602_v9 }
 0x177   : > { %708 = vst [vmem:[%s1706_s13 + $0x18] sm:$0xff] %v667_v10 }
 0x17a   : > { %v604_v11 = vpop.f32.mrf.mxu2 }
 0x17b   : > { %v669_v12 = vpop.f32.mrf.mxu3  ;;  %v605_v13 = vadd.f32 %v1697_v62, %v604_v11 }
 0x17d   : > { %v670_v14 = vadd.f32 %v669_v12, %v605_v13 }
 0x17f   : > { %709 = vst [vmem:[%s1706_s13 + $0x20] sm:$0xff] %v670_v14 }
 0x182   : > { %v607_v15 = vpop.f32.mrf.mxu2 }
 0x183   : > { %v672_v16 = vpop.f32.mrf.mxu3  ;;  %v608_v17 = vadd.f32 %v1697_v62, %v607_v15 }
 0x185   : > { %v673_v18 = vadd.f32 %v672_v16, %v608_v17 }
 0x187   : > { %710 = vst [vmem:[%s1706_s13 + $0x28] sm:$0xff] %v673_v18 }
 0x18a   : > { %v610_v19 = vpop.f32.mrf.mxu2 }
 0x18b   : > { %v675_v20 = vpop.f32.mrf.mxu3  ;;  %v611_v21 = vadd.f32 %v1697_v62, %v610_v19 }
 0x18d   : > { %v676_v22 = vadd.f32 %v675_v20, %v611_v21 }
 0x18f   : > { %711 = vst [vmem:[%s1706_s13 + $0x30] sm:$0xff] %v676_v22 }
 0x192   : > { %v613_v23 = vpop.f32.mrf.mxu2 }
 0x193   : > { %v678_v24 = vpop.f32.mrf.mxu3  ;;  %v614_v25 = vadd.f32 %v1697_v62, %v613_v23 }
 0x195   : > { %v679_v26 = vadd.f32 %v678_v24, %v614_v25 }
 0x197   : > { %712 = vst [vmem:[%s1706_s13 + $0x38] sm:$0xff] %v679_v26 }
 0x19a   : > { %v616_v27 = vpop.f32.mrf.mxu2 }
 0x19b   : > { %v681_v28 = vpop.f32.mrf.mxu3  ;;  %v617_v29 = vadd.f32 %v1697_v62, %v616_v27 }
 0x19d   : > { %v682_v30 = vadd.f32 %v681_v28, %v617_v29 }
 0x19f   : > { %713 = vst [vmem:[%s1706_s13 + $0x40] sm:$0xff] %v682_v30 }
 0x1a2   : > { %v619_v31 = vpop.f32.mrf.mxu2 }
 0x1a3   : > { %v684_v32 = vpop.f32.mrf.mxu3  ;;  %v620_v33 = vadd.f32 %v1697_v62, %v619_v31 }
 0x1a5   : > { %v685_v34 = vadd.f32 %v684_v32, %v620_v33 }
 0x1a7   : > { %714 = vst [vmem:[%s1706_s13 + $0x48] sm:$0xff] %v685_v34 }
 0x1aa   : > { %v622_v35 = vpop.f32.mrf.mxu2 }
 0x1ab   : > { %v687_v36 = vpop.f32.mrf.mxu3  ;;  %v623_v37 = vadd.f32 %v1697_v62, %v622_v35 }
 0x1ad   : > { %v688_v38 = vadd.f32 %v687_v36, %v623_v37 }
 0x1af   : > { %715 = vst [vmem:[%s1706_s13 + $0x50] sm:$0xff] %v688_v38 }
 0x1b2   : > { %v625_v39 = vpop.f32.mrf.mxu2 }
 0x1b3   : > { %v690_v40 = vpop.f32.mrf.mxu3  ;;  %v626_v41 = vadd.f32 %v1697_v62, %v625_v39 }
 0x1b5   : > { %v691_v42 = vadd.f32 %v690_v40, %v626_v41 }
 0x1b7   : > { %716 = vst [vmem:[%s1706_s13 + $0x58] sm:$0xff] %v691_v42 }
 0x1ba   : > { %v628_v43 = vpop.f32.mrf.mxu2 }
 0x1bb   : > { %v693_v44 = vpop.f32.mrf.mxu3  ;;  %v629_v45 = vadd.f32 %v1697_v62, %v628_v43 }
 0x1bd   : > { %v694_v46 = vadd.f32 %v693_v44, %v629_v45 }
 0x1bf   : > { %717 = vst [vmem:[%s1706_s13 + $0x60] sm:$0xff] %v694_v46 }
 0x1c2   : > { %v631_v47 = vpop.f32.mrf.mxu2 }
 0x1c3   : > { %v696_v48 = vpop.f32.mrf.mxu3  ;;  %v632_v51 = vadd.f32 %v1697_v62, %v631_v47 }
 0x1c5   : > { %v697_v52 = vadd.f32 %v696_v48, %v632_v51 }
 0x1c7   : > { %718 = vst [vmem:[%s1706_s13 + $0x68] sm:$0xff] %v697_v52 }
 0x1ca   : > { %v634_v53 = vpop.f32.mrf.mxu2 }
 0x1cb   : > { %v699_v54 = vpop.f32.mrf.mxu3  ;;  %v635_v56 = vadd.f32 %v1697_v62, %v634_v53 }
 0x1cd   : > { %v700_v58 = vadd.f32 %v699_v54, %v635_v56 }
 0x1cf   : > { %719 = vst [vmem:[%s1706_s13 + $0x70] sm:$0xff] %v700_v58 }
 0x1d2   : > { %v637_v59 = vpop.f32.mrf.mxu2 }
 0x1d3   : > { %v702_v60 = vpop.f32.mrf.mxu3  ;;  %v638_v61 = vadd.f32 %v1697_v62, %v637_v59 }
 0x1d5   : > { %v703_v49 = vadd.f32 %v702_v60, %v638_v61 }
 0x1d7   : > { %720 = vst [vmem:[%s1706_s13 + $0x78] sm:$0xff] %v703_v49 }
 0x1d8   : > { %1202 = shalt.err (!%p1199_p4)
}
 0x1d9   : > { %s1259_s9 = smov 128   ;;  %s1260_s13 = smov 8  }
 0x1da   : > { %986 = dma.vmem_to_hbm [thread:$0]  (%p1362_p3), %s772_s8, 2048, %s774_s14, %s754_s19, %s1259_s9, %s1259_s9, %s1260_s13  }
 0x1db PF: > { %s806_s30 = sand.u32 1, %s1237_s21   ;;  %p1797_p8 = scmp.ge.s32.totalorder %s1249_s24, 2 }
 0x1dc   : > { %s807_s20 = scalar_lea.sflag [#allocation4], %s806_s30 }
 0x1dd   : > { %p1002_p11 = pnand %p1797_p8, %p1331_p6 }
 0x1df   : > { %p1003_p2 = pneg %p1002_p11 }
 0x1e1   : > { %1228 = dma.done.wait (%p1003_p2), %s807_s20, 2048  }
 0x1e2   : > { %1230 = vsyncadd (%p1003_p2), %s807_s20, 4294965248  ;;  %s817_s7 = scalar_lea.sflag [#allocation10], %s806_s30 }
 0x1e3   : > { %1232 = dma.done.wait (%p1003_p2), %s817_s7, 4096  }
 0x1e4   : > { %1234 = vsyncadd (%p1003_p2), %s817_s7, 4294963200  ;;  %p24_p3 = scmp.ge.s32.totalorder %s1352_s18, 4   ;;  %s1798_s21 = smov %s1241_s22 }
 0x1e5   : > { %s1799_s22 = smov %s1245_s23  ;;  %s1800_s23 = smov %s1368_s29 }
 0x1e6   : > { %s1801_s24 = smov %s1352_s18  ;;  %26 = sbr.rel (!%p24_p3) target bundleno = 8 (0x8), region = 110 }
 0x1eb   :  { %823 = vsyncpa [#allocation3], 1 }
 0x1ec   :  { %825 = vsyncpa [#allocation3 + $0x1], 1 }
 0x1ed   :  { %826 = vsyncpa [#allocation6], 1 }
 0x1ee   :  { %827 = vsyncpa [#allocation4], 1 }
 0x1ef   :  { %829 = vsyncpa [#allocation4 + $0x1], 1 }
 0x1f0   :  { %830 = vsyncpa [#allocation10], 1 }
 0x1f1   :  { %832 = vsyncpa [#allocation10 + $0x1], 1 }

</bundles_post_ra>
